<compile_context>
chip_gen: v7x
topology: tpu7x:2x2x1
jax: 0.10.0
libtpu: 0.0.40
codegen_flags: <defaults>
</compile_context>

<pallas_src>
import functools
import math

import jax
import jax.numpy as jnp
from jax import lax
from jax.experimental import pallas as pl
from jax.experimental.pallas import tpu as pltpu
from jax.scipy.special import erf as _erf_exact


# ----------------------------- in-kernel helpers -----------------------------

def _erf_approx_f32(x):
    """Abramowitz & Stegun 7.1.26 rational approximation of erf (|err|<=1.5e-7).

    Built only from elementwise ops with guaranteed Mosaic lowerings.
    """
    a1, a2, a3, a4, a5 = (0.254829592, -0.284496736, 1.421413741,
                          -1.453152027, 1.061405429)
    p = 0.3275911
    ax = jnp.abs(x)
    t = 1.0 / (1.0 + p * ax)
    poly = ((((a5 * t + a4) * t + a3) * t + a2) * t + a1) * t
    y = 1.0 - poly * jnp.exp(-ax * ax)
    return jnp.where(x < 0.0, -y, y)


def _gelu_exact(x):
    # gelu(x) = x * 0.5 * (1 + erf(x / sqrt(2)))  -- matches the torch module
    return x * 0.5 * (1.0 + _erf_approx_f32(x * (1.0 / math.sqrt(2.0))))


def _layernorm(x, gamma, beta, eps):
    mean = jnp.mean(x, axis=-1, keepdims=True)
    xc = x - mean
    var = jnp.mean(xc * xc, axis=-1, keepdims=True)
    return xc * lax.rsqrt(var + eps) * gamma + beta


# --------------------------------- kernels -----------------------------------

def _qkv_proj_kernel(x_ref, wq_ref, bq_ref, wk_ref, bk_ref, wv_ref, bv_ref,
                     q_ref, k_ref, v_ref):
    """Fused Q/K/V projections for one (TQ, H) token tile (native-dtype MXU)."""
    x = x_ref[...]
    q = (jnp.dot(x, wq_ref[...], preferred_element_type=jnp.float32)
         + bq_ref[...].astype(jnp.float32))
    k = (jnp.dot(x, wk_ref[...], preferred_element_type=jnp.float32)
         + bk_ref[...].astype(jnp.float32))
    v = (jnp.dot(x, wv_ref[...], preferred_element_type=jnp.float32)
         + bv_ref[...].astype(jnp.float32))
    q_ref[...] = q.astype(q_ref.dtype)
    k_ref[...] = k.astype(k_ref.dtype)
    v_ref[...] = v.astype(v_ref.dtype)


def _make_attn_kernel(scale):
    def kernel(q_ref, k_ref, v_ref, mask_ref, ctx_ref):
        # one (batch, head) pair per grid step -> only one (S,S) score tile live
        q = q_ref[0, 0]                               # (S, hd)
        k = k_ref[0, 0]                               # (S, hd)
        v = v_ref[0, 0]                               # (S, hd)
        mask = mask_ref[0, 0].astype(jnp.float32)     # (1, S) additive key mask
        s = jnp.einsum('qd,kd->qk', q, k,
                       preferred_element_type=jnp.float32)
        s = s * scale + mask
        m = jnp.max(s, axis=-1, keepdims=True)
        e = jnp.exp(s - m)
        l = jnp.sum(e, axis=-1, keepdims=True)
        p = e * pl.reciprocal(l, approx=True)
        # TODO(synk): attention-prob dropout is identity at inference and
        # head_mask is None (module default); the multiply path is omitted.
        ctx = jnp.einsum('qk,kd->qd', p.astype(v.dtype), v,
                         preferred_element_type=jnp.float32)
        ctx_ref[0, 0] = ctx.astype(ctx_ref.dtype)
    return kernel


def _make_post_kernel(eps):
    def kernel(ctx_ref, res_ref, wo_ref, bo_ref, g1_ref, be1_ref,
               wi_ref, bi_ref, w2_ref, b2_ref, g2_ref, be2_ref,
               out_ref, attn_sc, acc_sc):
        j = pl.program_id(1)

        @pl.when(j == 0)
        def _():
            # BertSelfOutput: dense + dropout(id) + LayerNorm(x + input)
            ctx = ctx_ref[...]
            res = res_ref[...].astype(jnp.float32)
            attn = (jnp.dot(ctx, wo_ref[...],
                            preferred_element_type=jnp.float32)
                    + bo_ref[...].astype(jnp.float32))
            attn_sc[...] = _layernorm(attn + res,
                                      g1_ref[...].astype(jnp.float32),
                                      be1_ref[...].astype(jnp.float32), eps)
            acc_sc[...] = jnp.zeros_like(acc_sc)

        # BertIntermediate (one TI-wide column block) + partial BertOutput dense
        attn = attn_sc[...]
        inter = (jnp.dot(attn.astype(wi_ref.dtype), wi_ref[...],
                         preferred_element_type=jnp.float32)
                 + bi_ref[...].astype(jnp.float32))
        inter = _gelu_exact(inter)
        acc_sc[...] += jnp.dot(inter.astype(w2_ref.dtype), w2_ref[...],
                               preferred_element_type=jnp.float32)

        @pl.when(j == pl.num_programs(1) - 1)
        def _():
            # BertOutput: + bias, + residual (post-LN1 attn), LayerNorm
            out = acc_sc[...] + b2_ref[...].astype(jnp.float32) + attn_sc[...]
            out = _layernorm(out, g2_ref[...].astype(jnp.float32),
                             be2_ref[...].astype(jnp.float32), eps)
            out_ref[...] = out.astype(out_ref.dtype)
    return kernel


# --------------------------------- wrapper ------------------------------------

def _pick_tile(n, candidates):
    for t in candidates:
        if n % t == 0:
            return t
    return n


def _padded_block_bytes(shape, dtype):
    """VMEM footprint of one block, padded to the (sublane, 128) tile."""
    itemsize = jnp.dtype(dtype).itemsize
    dims = list(shape)
    if dims:
        dims[-1] = -(-dims[-1] // 128) * 128
    if len(dims) >= 2:
        sub = 8 if itemsize >= 4 else 8 * (4 // itemsize)
        dims[-2] = -(-dims[-2] // sub) * sub
    n = 1
    for d in dims:
        n *= d
    return n * itemsize


def _vmem_limit(block_bytes, scratch_bytes=0):
    # double-buffered pipeline blocks + scratch + headroom, clamped to the
    # smallest physical VMEM of any current generation (64 MiB on v7x).
    total = 2 * sum(block_bytes) + scratch_bytes + (2 << 20)
    return int(min(64 << 20, max(total, 8 << 20)))


@functools.partial(jax.jit, static_argnames=("num_heads", "eps"))
def bert_layer_pallas(hidden_states, attention_mask, params, *,
                      num_heads, eps=1e-12):
    B, S, H = hidden_states.shape
    nh = num_heads
    hd = H // nh
    N = B * S
    I = params['wi'].shape[-1]

    act_dt = hidden_states.dtype          # activation / inter-kernel dtype
    w_dt = params['wq'].dtype
    act_sz = jnp.dtype(act_dt).itemsize
    w_sz = jnp.dtype(w_dt).itemsize

    TQ = _pick_tile(N, (512, 256, 128, 64, 32, 16, 8))
    TI = _pick_tile(I, (1024, 512, 256, 128))
    n_tiles = N // TQ
    n_iblk = I // TI

    x2 = hidden_states.reshape(N, H)
    # TODO(synk): only per-key additive masks (broadcast over queries) are
    # supported; an extended (B,1,S,S) causal/decoder mask is not handled.
    mask4 = attention_mask.reshape(B, 1, 1, S).astype(jnp.float32)

    def row(v):
        return v.reshape(1, -1)

    # ---- 1) fused Q/K/V projection over token tiles ----
    tok_spec = pl.BlockSpec((TQ, H), lambda i: (i, 0))
    k1_blocks = [((TQ, H), act_dt)] * 4 \
              + [((H, H), w_dt)] * 3 + [((1, H), w_dt)] * 3
    q2, k2, v2 = pl.pallas_call(
        _qkv_proj_kernel,
        grid=(n_tiles,),
        in_specs=[tok_spec,
                  pl.BlockSpec((H, H), lambda i: (0, 0)),
                  pl.BlockSpec((1, H), lambda i: (0, 0)),
                  pl.BlockSpec((H, H), lambda i: (0, 0)),
                  pl.BlockSpec((1, H), lambda i: (0, 0)),
                  pl.BlockSpec((H, H), lambda i: (0, 0)),
                  pl.BlockSpec((1, H), lambda i: (0, 0))],
        out_specs=(tok_spec, tok_spec, tok_spec),
        out_shape=(jax.ShapeDtypeStruct((N, H), act_dt),) * 3,
        compiler_params=pltpu.CompilerParams(
            dimension_semantics=("parallel",),
            vmem_limit_bytes=_vmem_limit(
                [_padded_block_bytes(s, d) for s, d in k1_blocks])),
        cost_estimate=pl.CostEstimate(
            flops=int(6 * N * H * H), transcendentals=0,
            bytes_accessed=int(act_sz * 4 * N * H
                               + w_sz * (3 * H * H + 3 * H))),
    )(x2,
      params['wq'], row(params['bq']),
      params['wk'], row(params['bk']),
      params['wv'], row(params['bv']))

    # ---- head split (pure relayout in XLA; see TODO at top of file) ----
    def split_heads(t):
        return t.reshape(B, S, nh, hd).transpose(0, 2, 1, 3)

    qh, kh, vh = split_heads(q2), split_heads(k2), split_heads(v2)

    # ---- 2) per-(batch, head) attention core ----
    head_spec = pl.BlockSpec((1, 1, S, hd), lambda b, h: (b, h, 0, 0))
    mask_spec = pl.BlockSpec((1, 1, 1, S), lambda b, h: (b, 0, 0, 0))
    k2_blocks = [((1, 1, S, hd), act_dt)] * 4 + [((1, 1, 1, S), jnp.float32)]
    ctx_h = pl.pallas_call(
        _make_attn_kernel(1.0 / math.sqrt(hd)),
        grid=(B, nh),
        in_specs=[head_spec, head_spec, head_spec, mask_spec],
        out_specs=head_spec,
        out_shape=jax.ShapeDtypeStruct((B, nh, S, hd), act_dt),
        compiler_params=pltpu.CompilerParams(
            dimension_semantics=("parallel", "parallel"),
            vmem_limit_bytes=_vmem_limit(
                [_padded_block_bytes(s, d) for s, d in k2_blocks],
                scratch_bytes=3 * _padded_block_bytes((S, S), jnp.float32))),
        cost_estimate=pl.CostEstimate(
            flops=int(4 * B * nh * S * S * hd),
            transcendentals=int(B * nh * S * S),
            bytes_accessed=int(act_sz * 4 * B * S * H + 4 * B * S)),
    )(qh, kh, vh, mask4)

    # ---- head merge (pure relayout in XLA; see TODO at top of file) ----
    ctx2 = ctx_h.transpose(0, 2, 1, 3).reshape(N, H)

    # ---- 3) fused self-output + intermediate(GELU) + output, streaming I ----
    ffn_tok_spec = pl.BlockSpec((TQ, H), lambda t, j: (t, 0))
    k3_blocks = [((TQ, H), act_dt)] * 3 \
              + [((H, H), w_dt), ((1, H), w_dt), ((1, H), w_dt), ((1, H), w_dt),
                 ((H, TI), w_dt), ((1, TI), w_dt), ((TI, H), w_dt),
                 ((1, H), w_dt), ((1, H), w_dt), ((1, H), w_dt)]
    k3_scratch = (2 * _padded_block_bytes((TQ, H), jnp.float32)
                  + 2 * _padded_block_bytes((TQ, TI), jnp.float32))
    out2 = pl.pallas_call(
        _make_post_kernel(eps),
        grid=(n_tiles, n_iblk),
        in_specs=[ffn_tok_spec,                                  # ctx
                  ffn_tok_spec,                                  # residual
                  pl.BlockSpec((H, H), lambda t, j: (0, 0)),     # wo
                  pl.BlockSpec((1, H), lambda t, j: (0, 0)),     # bo
                  pl.BlockSpec((1, H), lambda t, j: (0, 0)),     # ln1 gamma
                  pl.BlockSpec((1, H), lambda t, j: (0, 0)),     # ln1 beta
                  pl.BlockSpec((H, TI), lambda t, j: (0, j)),    # wi block
                  pl.BlockSpec((1, TI), lambda t, j: (0, j)),    # bi block
                  pl.BlockSpec((TI, H), lambda t, j: (j, 0)),    # w2 block
                  pl.BlockSpec((1, H), lambda t, j: (0, 0)),     # b2
                  pl.BlockSpec((1, H), lambda t, j: (0, 0)),     # ln2 gamma
                  pl.BlockSpec((1, H), lambda t, j: (0, 0))],    # ln2 beta
        out_specs=ffn_tok_spec,
        out_shape=jax.ShapeDtypeStruct((N, H), act_dt),
        scratch_shapes=[pltpu.VMEM((TQ, H), jnp.float32),   # post-LN1 attn
                        pltpu.VMEM((TQ, H), jnp.float32)],  # FFN2 accumulator
        compiler_params=pltpu.CompilerParams(
            dimension_semantics=("parallel", "arbitrary"),
            vmem_limit_bytes=_vmem_limit(
                [_padded_block_bytes(s, d) for s, d in k3_blocks],
                scratch_bytes=k3_scratch)),
        cost_estimate=pl.CostEstimate(
            flops=int(2 * N * (H * H + 2 * H * I) + 12 * N * H),
            transcendentals=int(N * I),
            bytes_accessed=int(act_sz * 3 * N * H
                               + w_sz * (H * H + 2 * H * I + 6 * H + I))),
    )(ctx2, x2,
      params['wo'], row(params['bo']),
      row(params['ln1_g']), row(params['ln1_b']),
      params['wi'], row(params['bi']),
      params['wo2'], row(params['bo2']),
      row(params['ln2_g']), row(params['ln2_b']))

    # TODO(synk): config.output_attentions=False path only (attention_probs are
    # not returned); prune_heads is a training-time utility, not implemented.
    return out2.reshape(B, S, H)


# ------------------------------ pure-JAX reference ----------------------------

def bert_layer_ref(hidden_states, attention_mask, params, *, num_heads,
                   eps=1e-12):
    B, S, H = hidden_states.shape
    nh = num_heads
    hd = H // nh
    hp = lax.Precision.HIGHEST

    def lin(t, w, b):
        return jnp.einsum('bsh,hk->bsk', t, w, precision=hp) + b

    def ln(t, g, b):
        m = t.mean(-1, keepdims=True)
        c = t - m
        v = (c * c).mean(-1, keepdims=True)
        return c * lax.rsqrt(v + eps) * g + b

    def split(t):
        return t.reshape(B, S, nh, hd).transpose(0, 2, 1, 3)

    q = split(lin(hidden_states, params['wq'], params['bq']))
    k = split(lin(hidden_states, params['wk'], params['bk']))
    v = split(lin(hidden_states, params['wv'], params['bv']))
    scores = jnp.einsum('bhqd,bhkd->bhqk', q, k, precision=hp) / math.sqrt(hd)
    scores = scores + attention_mask.reshape(B, 1, 1, S)
    probs = jax.nn.softmax(scores, axis=-1)
    ctx = jnp.einsum('bhqk,bhkd->bhqd', probs, v, precision=hp)
    ctx = ctx.transpose(0, 2, 1, 3).reshape(B, S, H)
    attn = ln(lin(ctx, params['wo'], params['bo']) + hidden_states,
              params['ln1_g'], params['ln1_b'])
    inter = lin(attn, params['wi'], params['bi'])
    inter = inter * 0.5 * (1.0 + _erf_exact(inter / math.sqrt(2.0)))
    out = ln(lin(inter, params['wo2'], params['bo2']) + attn,
             params['ln2_g'], params['ln2_b'])
    return out


if __name__ == "__main__":
    B, S, H, NH, I = 2, 8, 32, 4, 128   # batch, seq, hidden, heads, intermediate
    eps = 1e-12

    key = jax.random.PRNGKey(0)
    ks = jax.random.split(key, 18)

    def init(k, shape, scale=0.02):
        return scale * jax.random.normal(k, shape, dtype=jnp.float32)

    # NOTE: weights are stored (in_features, out_features); a torch nn.Linear
    # weight would be transposed before being passed here.
    params = dict(
        wq=init(ks[0], (H, H)), bq=init(ks[1], (H,)),
        wk=init(ks[2], (H, H)), bk=init(ks[3], (H,)),
        wv=init(ks[4], (H, H)), bv=init(ks[5], (H,)),
        wo=init(ks[6], (H, H)), bo=init(ks[7], (H,)),
        ln1_g=1.0 + init(ks[8], (H,), 0.1), ln1_b=init(ks[9], (H,), 0.1),
        wi=init(ks[10], (H, I)), bi=init(ks[11], (I,)),
        wo2=init(ks[12], (I, H)), bo2=init(ks[13], (H,)),
        ln2_g=1.0 + init(ks[14], (H,), 0.1), ln2_b=init(ks[15], (H,), 0.1),
    )
    hidden_states = init(ks[16], (B, S, H), 1.0)

    # standard BERT additive mask: 0 for kept keys, -10000 for masked keys;
    # mask out the last two key positions of batch element 1.
    key_keep = jnp.ones((B, S), jnp.float32).at[1, S - 2:].set(0.0)
    attention_mask = ((1.0 - key_keep) * -10000.0).reshape(B, 1, 1, S)

    ref = bert_layer_ref(hidden_states, attention_mask, params,
                         num_heads=NH, eps=eps)

    # f32 model dtype: matmuls run in f32 (matches an f32 torch module).
    out = bert_layer_pallas(hidden_states, attention_mask, params,
                            num_heads=NH, eps=eps)
    out = jax.block_until_ready(out)
    assert out.shape == (B, S, H)
    assert jnp.allclose(out, ref, rtol=2e-3, atol=2e-3), (
        "f32 mismatch vs reference: max abs err = "
        f"{float(jnp.max(jnp.abs(out - ref)))}")

    # bf16 model dtype: the fast path — bf16 activations/weights on the MXU,
    # f32 only inside softmax / LayerNorm / accumulators.
    params_bf16 = jax.tree_util.tree_map(
        lambda a: a.astype(jnp.bfloat16), params)
    out_bf16 = bert_layer_pallas(hidden_states.astype(jnp.bfloat16),
                                 attention_mask, params_bf16,
                                 num_heads=NH, eps=eps)
    out_bf16 = jax.block_until_ready(out_bf16).astype(jnp.float32)
    assert out_bf16.shape == (B, S, H)
    assert jnp.allclose(out_bf16, ref, rtol=5e-2, atol=5e-2), (
        "bf16 mismatch vs reference: max abs err = "
        f"{float(jnp.max(jnp.abs(out_bf16 - ref)))}")

    print("KERNEL_OK")
</pallas_src>

<mosaic_0001>
module attributes {stable_mosaic.version = 11 : i64} {
  func.func @_qkv_proj_kernel(%arg0: i32, %arg1: memref<16x32xf32, #tpu.memory_space<vmem>>, %arg2: memref<32x32xf32, #tpu.memory_space<vmem>>, %arg3: memref<1x32xf32, #tpu.memory_space<vmem>>, %arg4: memref<32x32xf32, #tpu.memory_space<vmem>>, %arg5: memref<1x32xf32, #tpu.memory_space<vmem>>, %arg6: memref<32x32xf32, #tpu.memory_space<vmem>>, %arg7: memref<1x32xf32, #tpu.memory_space<vmem>>, %arg8: memref<16x32xf32, #tpu.memory_space<vmem>>, %arg9: memref<16x32xf32, #tpu.memory_space<vmem>>, %arg10: memref<16x32xf32, #tpu.memory_space<vmem>>) attributes {dimension_semantics = [#tpu.dimension_semantics<parallel>], iteration_bounds = array<i64: 1>, scalar_prefetch = 0 : i64, scratch_operands = 0 : i64, tpu.core_type = #tpu.core_type<tc>, window_params = [{transform_indices = @transform_0, window_bounds = array<i64: 16, 32>}, {pipeline_mode = #tpu.pipeline_mode<synchronous>, transform_indices = @transform_1, window_bounds = array<i64: 32, 32>}, {pipeline_mode = #tpu.pipeline_mode<synchronous>, transform_indices = @transform_2, window_bounds = array<i64: 1, 32>}, {pipeline_mode = #tpu.pipeline_mode<synchronous>, transform_indices = @transform_3, window_bounds = array<i64: 32, 32>}, {pipeline_mode = #tpu.pipeline_mode<synchronous>, transform_indices = @transform_4, window_bounds = array<i64: 1, 32>}, {pipeline_mode = #tpu.pipeline_mode<synchronous>, transform_indices = @transform_5, window_bounds = array<i64: 32, 32>}, {pipeline_mode = #tpu.pipeline_mode<synchronous>, transform_indices = @transform_6, window_bounds = array<i64: 1, 32>}, {transform_indices = @transform_7, window_bounds = array<i64: 16, 32>}, {transform_indices = @transform_8, window_bounds = array<i64: 16, 32>}, {transform_indices = @transform_9, window_bounds = array<i64: 16, 32>}]} {
    %c0 = arith.constant 0 : index
    %c0_0 = arith.constant 0 : index
    %0 = vector.load %arg1[%c0, %c0_0] : memref<16x32xf32, #tpu.memory_space<vmem>>, vector<16x32xf32>
    %c0_1 = arith.constant 0 : index
    %c0_2 = arith.constant 0 : index
    %1 = vector.load %arg2[%c0_1, %c0_2] : memref<32x32xf32, #tpu.memory_space<vmem>>, vector<32x32xf32>
    %cst = arith.constant dense<0.000000e+00> : vector<16x32xf32>
    %2 = tpu.matmul %0, %1, %cst {dimension_numbers = #tpu.dot_dimension_numbers<[1], [0], [0], [1], [0, 0, 1, 1], [], []>} : vector<16x32xf32>, vector<32x32xf32>, vector<16x32xf32> -> vector<16x32xf32>
    %c0_3 = arith.constant 0 : index
    %c0_4 = arith.constant 0 : index
    %3 = vector.load %arg3[%c0_3, %c0_4] : memref<1x32xf32, #tpu.memory_space<vmem>>, vector<1x32xf32>
    %4 = vector.broadcast %3 : vector<1x32xf32> to vector<16x32xf32>
    %5 = arith.addf %2, %4 : vector<16x32xf32>
    %c0_5 = arith.constant 0 : index
    %c0_6 = arith.constant 0 : index
    %6 = vector.load %arg4[%c0_5, %c0_6] : memref<32x32xf32, #tpu.memory_space<vmem>>, vector<32x32xf32>
    %cst_7 = arith.constant dense<0.000000e+00> : vector<16x32xf32>
    %7 = tpu.matmul %0, %6, %cst_7 {dimension_numbers = #tpu.dot_dimension_numbers<[1], [0], [0], [1], [0, 0, 1, 1], [], []>} : vector<16x32xf32>, vector<32x32xf32>, vector<16x32xf32> -> vector<16x32xf32>
    %c0_8 = arith.constant 0 : index
    %c0_9 = arith.constant 0 : index
    %8 = vector.load %arg5[%c0_8, %c0_9] : memref<1x32xf32, #tpu.memory_space<vmem>>, vector<1x32xf32>
    %9 = vector.broadcast %8 : vector<1x32xf32> to vector<16x32xf32>
    %10 = arith.addf %7, %9 : vector<16x32xf32>
    %c0_10 = arith.constant 0 : index
    %c0_11 = arith.constant 0 : index
    %11 = vector.load %arg6[%c0_10, %c0_11] : memref<32x32xf32, #tpu.memory_space<vmem>>, vector<32x32xf32>
    %cst_12 = arith.constant dense<0.000000e+00> : vector<16x32xf32>
    %12 = tpu.matmul %0, %11, %cst_12 {dimension_numbers = #tpu.dot_dimension_numbers<[1], [0], [0], [1], [0, 0, 1, 1], [], []>} : vector<16x32xf32>, vector<32x32xf32>, vector<16x32xf32> -> vector<16x32xf32>
    %c0_13 = arith.constant 0 : index
    %c0_14 = arith.constant 0 : index
    %13 = vector.load %arg7[%c0_13, %c0_14] : memref<1x32xf32, #tpu.memory_space<vmem>>, vector<1x32xf32>
    %14 = vector.broadcast %13 : vector<1x32xf32> to vector<16x32xf32>
    %15 = arith.addf %12, %14 : vector<16x32xf32>
    %c0_15 = arith.constant 0 : index
    %c0_16 = arith.constant 0 : index
    %16 = vector.load %arg8[%c0_15, %c0_16] : memref<16x32xf32, #tpu.memory_space<vmem>>, vector<16x32xf32>
    tpu.vector_store %arg8[%c0_15, %c0_16], %5 {strides = array<i32>} : memref<16x32xf32, #tpu.memory_space<vmem>>, vector<16x32xf32>,
    %c0_17 = arith.constant 0 : index
    %c0_18 = arith.constant 0 : index
    %17 = vector.load %arg9[%c0_17, %c0_18] : memref<16x32xf32, #tpu.memory_space<vmem>>, vector<16x32xf32>
    tpu.vector_store %arg9[%c0_17, %c0_18], %10 {strides = array<i32>} : memref<16x32xf32, #tpu.memory_space<vmem>>, vector<16x32xf32>,
    %c0_19 = arith.constant 0 : index
    %c0_20 = arith.constant 0 : index
    %18 = vector.load %arg10[%c0_19, %c0_20] : memref<16x32xf32, #tpu.memory_space<vmem>>, vector<16x32xf32>
    tpu.vector_store %arg10[%c0_19, %c0_20], %15 {strides = array<i32>} : memref<16x32xf32, #tpu.memory_space<vmem>>, vector<16x32xf32>,
    return
  }
  func.func @transform_0(%arg0: i32) -> (i32, i32) {
    %c0_i32 = arith.constant 0 : i32
    %c0_i32_0 = arith.constant 0 : i32
    return %arg0, %c0_i32 : i32, i32
  }
  func.func @transform_1(%arg0: i32) -> (i32, i32) {
    %c0_i32 = arith.constant 0 : i32
    %c0_i32_0 = arith.constant 0 : i32
    %c0_i32_1 = arith.constant 0 : i32
    return %c0_i32, %c0_i32_0 : i32, i32
  }
  func.func @transform_2(%arg0: i32) -> (i32, i32) {
    %c0_i32 = arith.constant 0 : i32
    %c0_i32_0 = arith.constant 0 : i32
    %c0_i32_1 = arith.constant 0 : i32
    return %c0_i32, %c0_i32_0 : i32, i32
  }
  func.func @transform_3(%arg0: i32) -> (i32, i32) {
    %c0_i32 = arith.constant 0 : i32
    %c0_i32_0 = arith.constant 0 : i32
    %c0_i32_1 = arith.constant 0 : i32
    return %c0_i32, %c0_i32_0 : i32, i32
  }
  func.func @transform_4(%arg0: i32) -> (i32, i32) {
    %c0_i32 = arith.constant 0 : i32
    %c0_i32_0 = arith.constant 0 : i32
    %c0_i32_1 = arith.constant 0 : i32
    return %c0_i32, %c0_i32_0 : i32, i32
  }
  func.func @transform_5(%arg0: i32) -> (i32, i32) {
    %c0_i32 = arith.constant 0 : i32
    %c0_i32_0 = arith.constant 0 : i32
    %c0_i32_1 = arith.constant 0 : i32
    return %c0_i32, %c0_i32_0 : i32, i32
  }
  func.func @transform_6(%arg0: i32) -> (i32, i32) {
    %c0_i32 = arith.constant 0 : i32
    %c0_i32_0 = arith.constant 0 : i32
    %c0_i32_1 = arith.constant 0 : i32
    return %c0_i32, %c0_i32_0 : i32, i32
  }
  func.func @transform_7(%arg0: i32) -> (i32, i32) {
    %c0_i32 = arith.constant 0 : i32
    %c0_i32_0 = arith.constant 0 : i32
    return %arg0, %c0_i32 : i32, i32
  }
  func.func @transform_8(%arg0: i32) -> (i32, i32) {
    %c0_i32 = arith.constant 0 : i32
    %c0_i32_0 = arith.constant 0 : i32
    return %arg0, %c0_i32 : i32, i32
  }
  func.func @transform_9(%arg0: i32) -> (i32, i32) {
    %c0_i32 = arith.constant 0 : i32
    %c0_i32_0 = arith.constant 0 : i32
    return %arg0, %c0_i32 : i32, i32
  }
}

module attributes {stable_mosaic.version = 11 : i64} {
  func.func @kernel(%arg0: i32, %arg1: i32, %arg2: memref<1x1x8x8xf32, #tpu.memory_space<vmem>>, %arg3: memref<1x1x8x8xf32, #tpu.memory_space<vmem>>, %arg4: memref<1x1x8x8xf32, #tpu.memory_space<vmem>>, %arg5: memref<1x1x1x8xf32, #tpu.memory_space<vmem>>, %arg6: memref<1x1x8x8xf32, #tpu.memory_space<vmem>>) attributes {dimension_semantics = [#tpu.dimension_semantics<parallel>, #tpu.dimension_semantics<parallel>], iteration_bounds = array<i64: 2, 4>, scalar_prefetch = 0 : i64, scratch_operands = 0 : i64, tpu.core_type = #tpu.core_type<tc>, window_params = [{transform_indices = @transform_0, window_bounds = array<i64: 1, 1, 8, 8>}, {transform_indices = @transform_1, window_bounds = array<i64: 1, 1, 8, 8>}, {transform_indices = @transform_2, window_bounds = array<i64: 1, 1, 8, 8>}, {transform_indices = @transform_3, window_bounds = array<i64: 1, 1, 1, 8>}, {transform_indices = @transform_4, window_bounds = array<i64: 1, 1, 8, 8>}]} {
    %c0 = arith.constant 0 : index
    %c0_0 = arith.constant 0 : index
    %c0_1 = arith.constant 0 : index
    %c0_2 = arith.constant 0 : index
    %0 = vector.load %arg2[%c0, %c0_0, %c0_1, %c0_2] : memref<1x1x8x8xf32, #tpu.memory_space<vmem>>, vector<1x1x8x8xf32>
    %1 = vector.shape_cast %0 : vector<1x1x8x8xf32> to vector<8x8xf32>
    %c0_3 = arith.constant 0 : index
    %c0_4 = arith.constant 0 : index
    %c0_5 = arith.constant 0 : index
    %c0_6 = arith.constant 0 : index
    %2 = vector.load %arg3[%c0_3, %c0_4, %c0_5, %c0_6] : memref<1x1x8x8xf32, #tpu.memory_space<vmem>>, vector<1x1x8x8xf32>
    %3 = vector.shape_cast %2 : vector<1x1x8x8xf32> to vector<8x8xf32>
    %c0_7 = arith.constant 0 : index
    %c0_8 = arith.constant 0 : index
    %c0_9 = arith.constant 0 : index
    %c0_10 = arith.constant 0 : index
    %4 = vector.load %arg4[%c0_7, %c0_8, %c0_9, %c0_10] : memref<1x1x8x8xf32, #tpu.memory_space<vmem>>, vector<1x1x8x8xf32>
    %5 = vector.shape_cast %4 : vector<1x1x8x8xf32> to vector<8x8xf32>
    %c0_11 = arith.constant 0 : index
    %c0_12 = arith.constant 0 : index
    %c0_13 = arith.constant 0 : index
    %c0_14 = arith.constant 0 : index
    %6 = vector.load %arg5[%c0_11, %c0_12, %c0_13, %c0_14] : memref<1x1x1x8xf32, #tpu.memory_space<vmem>>, vector<1x1x1x8xf32>
    %7 = vector.shape_cast %6 : vector<1x1x1x8xf32> to vector<1x8xf32>
    "tpu.trace_start"() <{level = 10 : i32, message = "qd,kd->qk"}> : () -> ()
    %cst = arith.constant dense<0.000000e+00> : vector<8x8xf32>
    %8 = tpu.matmul %1, %3, %cst {dimension_numbers = #tpu.dot_dimension_numbers<[1], [1], [0], [0], [0, 0, 1, 0], [], []>} : vector<8x8xf32>, vector<8x8xf32>, vector<8x8xf32> -> vector<8x8xf32>
    "tpu.trace_stop"() : () -> ()
    %cst_15 = arith.constant 0.353553385 : f32
    %9 = vector.broadcast %cst_15 : f32 to vector<8x8xf32>
    %10 = arith.mulf %8, %9 : vector<8x8xf32>
    %11 = vector.broadcast %7 : vector<1x8xf32> to vector<8x8xf32>
    %12 = arith.addf %10, %11 : vector<8x8xf32>
    %cst_16 = arith.constant dense<0xFF800000> : vector<8xf32>
    %13 = vector.multi_reduction <maximumf>, %12, %cst_16 [1] : vector<8x8xf32> to vector<8xf32>
    %14 = vector.shape_cast %13 : vector<8xf32> to vector<8x1xf32>
    %15 = vector.broadcast %14 : vector<8x1xf32> to vector<8x8xf32>
    %16 = arith.subf %12, %15 : vector<8x8xf32>
    %17 = math.exp %16 : vector<8x8xf32>
    %cst_17 = arith.constant dense<0.000000e+00> : vector<8xf32>
    %18 = vector.multi_reduction <add>, %17, %cst_17 [1] : vector<8x8xf32> to vector<8xf32>
    %19 = vector.shape_cast %18 : vector<8xf32> to vector<8x1xf32>
    %20 = tpu.reciprocal %19 {approx = true} : vector<8x1xf32> -> vector<8x1xf32>
    %21 = vector.broadcast %20 : vector<8x1xf32> to vector<8x8xf32>
    %22 = arith.mulf %17, %21 : vector<8x8xf32>
    "tpu.trace_start"() <{level = 10 : i32, message = "qk,kd->qd"}> : () -> ()
    %cst_18 = arith.constant dense<0.000000e+00> : vector<8x8xf32>
    %23 = tpu.matmul %22, %5, %cst_18 {dimension_numbers = #tpu.dot_dimension_numbers<[1], [0], [0], [1], [0, 0, 1, 1], [], []>} : vector<8x8xf32>, vector<8x8xf32>, vector<8x8xf32> -> vector<8x8xf32>
    "tpu.trace_stop"() : () -> ()
    %c0_19 = arith.constant 0 : index
    %c0_20 = arith.constant 0 : index
    %c0_21 = arith.constant 0 : index
    %c0_22 = arith.constant 0 : index
    %24 = vector.load %arg6[%c0_19, %c0_20, %c0_21, %c0_22] : memref<1x1x8x8xf32, #tpu.memory_space<vmem>>, vector<1x1x8x8xf32>
    %25 = vector.shape_cast %24 : vector<1x1x8x8xf32> to vector<8x8xf32>
    %26 = vector.shape_cast %23 : vector<8x8xf32> to vector<1x1x8x8xf32>
    tpu.vector_store %arg6[%c0_19, %c0_20, %c0_21, %c0_22], %26 {strides = array<i32>} : memref<1x1x8x8xf32, #tpu.memory_space<vmem>>, vector<1x1x8x8xf32>,
    return
  }
  func.func @transform_0(%arg0: i32, %arg1: i32) -> (i32, i32, i32, i32) {
    %c0_i32 = arith.constant 0 : i32
    %c0_i32_0 = arith.constant 0 : i32
    %c0_i32_1 = arith.constant 0 : i32
    return %arg0, %arg1, %c0_i32, %c0_i32_0 : i32, i32, i32, i32
  }
  func.func @transform_1(%arg0: i32, %arg1: i32) -> (i32, i32, i32, i32) {
    %c0_i32 = arith.constant 0 : i32
    %c0_i32_0 = arith.constant 0 : i32
    %c0_i32_1 = arith.constant 0 : i32
    return %arg0, %arg1, %c0_i32, %c0_i32_0 : i32, i32, i32, i32
  }
  func.func @transform_2(%arg0: i32, %arg1: i32) -> (i32, i32, i32, i32) {
    %c0_i32 = arith.constant 0 : i32
    %c0_i32_0 = arith.constant 0 : i32
    %c0_i32_1 = arith.constant 0 : i32
    return %arg0, %arg1, %c0_i32, %c0_i32_0 : i32, i32, i32, i32
  }
  func.func @transform_3(%arg0: i32, %arg1: i32) -> (i32, i32, i32, i32) {
    %c0_i32 = arith.constant 0 : i32
    %c0_i32_0 = arith.constant 0 : i32
    %c0_i32_1 = arith.constant 0 : i32
    %c0_i32_2 = arith.constant 0 : i32
    return %arg0, %c0_i32, %c0_i32_0, %c0_i32_1 : i32, i32, i32, i32
  }
  func.func @transform_4(%arg0: i32, %arg1: i32) -> (i32, i32, i32, i32) {
    %c0_i32 = arith.constant 0 : i32
    %c0_i32_0 = arith.constant 0 : i32
    %c0_i32_1 = arith.constant 0 : i32
    return %arg0, %arg1, %c0_i32, %c0_i32_0 : i32, i32, i32, i32
  }
}

module attributes {stable_mosaic.version = 11 : i64} {
  func.func @kernel(%arg0: i32, %arg1: i32, %arg2: memref<16x32xf32, #tpu.memory_space<vmem>>, %arg3: memref<16x32xf32, #tpu.memory_space<vmem>>, %arg4: memref<32x32xf32, #tpu.memory_space<vmem>>, %arg5: memref<1x32xf32, #tpu.memory_space<vmem>>, %arg6: memref<1x32xf32, #tpu.memory_space<vmem>>, %arg7: memref<1x32xf32, #tpu.memory_space<vmem>>, %arg8: memref<32x128xf32, #tpu.memory_space<vmem>>, %arg9: memref<1x128xf32, #tpu.memory_space<vmem>>, %arg10: memref<128x32xf32, #tpu.memory_space<vmem>>, %arg11: memref<1x32xf32, #tpu.memory_space<vmem>>, %arg12: memref<1x32xf32, #tpu.memory_space<vmem>>, %arg13: memref<1x32xf32, #tpu.memory_space<vmem>>, %arg14: memref<16x32xf32, #tpu.memory_space<vmem>>, %arg15: memref<16x32xf32, #tpu.memory_space<vmem>>, %arg16: memref<16x32xf32, #tpu.memory_space<vmem>>) attributes {dimension_semantics = [#tpu.dimension_semantics<parallel>, #tpu.dimension_semantics<arbitrary>], iteration_bounds = array<i64: 1, 1>, scalar_prefetch = 0 : i64, scratch_operands = 2 : i64, tpu.core_type = #tpu.core_type<tc>, window_params = [{transform_indices = @transform_0, window_bounds = array<i64: 16, 32>}, {transform_indices = @transform_1, window_bounds = array<i64: 16, 32>}, {pipeline_mode = #tpu.pipeline_mode<synchronous>, transform_indices = @transform_2, window_bounds = array<i64: 32, 32>}, {pipeline_mode = #tpu.pipeline_mode<synchronous>, transform_indices = @transform_3, window_bounds = array<i64: 1, 32>}, {pipeline_mode = #tpu.pipeline_mode<synchronous>, transform_indices = @transform_4, window_bounds = array<i64: 1, 32>}, {pipeline_mode = #tpu.pipeline_mode<synchronous>, transform_indices = @transform_5, window_bounds = array<i64: 1, 32>}, {transform_indices = @transform_6, window_bounds = array<i64: 32, 128>}, {transform_indices = @transform_7, window_bounds = array<i64: 1, 128>}, {transform_indices = @transform_8, window_bounds = array<i64: 128, 32>}, {pipeline_mode = #tpu.pipeline_mode<synchronous>, transform_indices = @transform_9, window_bounds = array<i64: 1, 32>}, {pipeline_mode = #tpu.pipeline_mode<synchronous>, transform_indices = @transform_10, window_bounds = array<i64: 1, 32>}, {pipeline_mode = #tpu.pipeline_mode<synchronous>, transform_indices = @transform_11, window_bounds = array<i64: 1, 32>}, {transform_indices = @transform_12, window_bounds = array<i64: 16, 32>}]} {
    %c0_i32 = arith.constant 0 : i32
    %0 = arith.cmpi eq, %arg1, %c0_i32 : i32
    %1 = arith.extui %0 : i1 to i32
    %c0_i32_0 = arith.constant 0 : i32
    %2 = arith.cmpi ne, %1, %c0_i32_0 : i32
    scf.if %2 {
      %c0_30 = arith.constant 0 : index
      %c0_31 = arith.constant 0 : index
      %57 = vector.load %arg2[%c0_30, %c0_31] : memref<16x32xf32, #tpu.memory_space<vmem>>, vector<16x32xf32>
      %c0_32 = arith.constant 0 : index
      %c0_33 = arith.constant 0 : index
      %58 = vector.load %arg3[%c0_32, %c0_33] : memref<16x32xf32, #tpu.memory_space<vmem>>, vector<16x32xf32>
      %c0_34 = arith.constant 0 : index
      %c0_35 = arith.constant 0 : index
      %59 = vector.load %arg4[%c0_34, %c0_35] : memref<32x32xf32, #tpu.memory_space<vmem>>, vector<32x32xf32>
      %cst_36 = arith.constant dense<0.000000e+00> : vector<16x32xf32>
      %60 = tpu.matmul %57, %59, %cst_36 {dimension_numbers = #tpu.dot_dimension_numbers<[1], [0], [0], [1], [0, 0, 1, 1], [], []>} : vector<16x32xf32>, vector<32x32xf32>, vector<16x32xf32> -> vector<16x32xf32>
      %c0_37 = arith.constant 0 : index
      %c0_38 = arith.constant 0 : index
      %61 = vector.load %arg5[%c0_37, %c0_38] : memref<1x32xf32, #tpu.memory_space<vmem>>, vector<1x32xf32>
      %62 = vector.broadcast %61 : vector<1x32xf32> to vector<16x32xf32>
      %63 = arith.addf %60, %62 : vector<16x32xf32>
      %64 = arith.addf %63, %58 : vector<16x32xf32>
      %c0_39 = arith.constant 0 : index
      %c0_40 = arith.constant 0 : index
      %65 = vector.load %arg6[%c0_39, %c0_40] : memref<1x32xf32, #tpu.memory_space<vmem>>, vector<1x32xf32>
      %c0_41 = arith.constant 0 : index
      %c0_42 = arith.constant 0 : index
      %66 = vector.load %arg7[%c0_41, %c0_42] : memref<1x32xf32, #tpu.memory_space<vmem>>, vector<1x32xf32>
      %cst_43 = arith.constant dense<0.000000e+00> : vector<16xf32>
      %67 = vector.multi_reduction <add>, %64, %cst_43 [1] : vector<16x32xf32> to vector<16xf32>
      %68 = vector.shape_cast %67 : vector<16xf32> to vector<16x1xf32>
      %cst_44 = arith.constant 3.200000e+01 : f32
      %69 = vector.broadcast %cst_44 : f32 to vector<16x1xf32>
      %70 = arith.divf %68, %69 : vector<16x1xf32>
      %71 = vector.broadcast %70 : vector<16x1xf32> to vector<16x32xf32>
      %72 = arith.subf %64, %71 : vector<16x32xf32>
      %73 = arith.mulf %72, %72 : vector<16x32xf32>
      %cst_45 = arith.constant dense<0.000000e+00> : vector<16xf32>
      %74 = vector.multi_reduction <add>, %73, %cst_45 [1] : vector<16x32xf32> to vector<16xf32>
      %75 = vector.shape_cast %74 : vector<16xf32> to vector<16x1xf32>
      %cst_46 = arith.constant 3.200000e+01 : f32
      %76 = vector.broadcast %cst_46 : f32 to vector<16x1xf32>
      %77 = arith.divf %75, %76 : vector<16x1xf32>
      %cst_47 = arith.constant 9.99999996E-13 : f32
      %78 = vector.broadcast %cst_47 : f32 to vector<16x1xf32>
      %79 = arith.addf %77, %78 : vector<16x1xf32>
      %80 = math.rsqrt %79 : vector<16x1xf32>
      %81 = vector.broadcast %80 : vector<16x1xf32> to vector<16x32xf32>
      %82 = arith.mulf %72, %81 : vector<16x32xf32>
      %83 = vector.broadcast %65 : vector<1x32xf32> to vector<16x32xf32>
      %84 = arith.mulf %82, %83 : vector<16x32xf32>
      %85 = vector.broadcast %66 : vector<1x32xf32> to vector<16x32xf32>
      %86 = arith.addf %84, %85 : vector<16x32xf32>
      %c0_48 = arith.constant 0 : index
      %c0_49 = arith.constant 0 : index
      %87 = vector.load %arg15[%c0_48, %c0_49] : memref<16x32xf32, #tpu.memory_space<vmem>>, vector<16x32xf32>
      tpu.vector_store %arg15[%c0_48, %c0_49], %86 {strides = array<i32>} : memref<16x32xf32, #tpu.memory_space<vmem>>, vector<16x32xf32>,
      %cst_50 = arith.constant 0.000000e+00 : f32
      %88 = vector.broadcast %cst_50 : f32 to vector<16x32xf32>
      %c0_51 = arith.constant 0 : index
      %c0_52 = arith.constant 0 : index
      %89 = vector.load %arg16[%c0_51, %c0_52] : memref<16x32xf32, #tpu.memory_space<vmem>>, vector<16x32xf32>
      tpu.vector_store %arg16[%c0_51, %c0_52], %88 {strides = array<i32>} : memref<16x32xf32, #tpu.memory_space<vmem>>, vector<16x32xf32>,
    } else {
    }
    %c0 = arith.constant 0 : index
    %c0_1 = arith.constant 0 : index
    %3 = vector.load %arg15[%c0, %c0_1] : memref<16x32xf32, #tpu.memory_space<vmem>>, vector<16x32xf32>
    %c0_2 = arith.constant 0 : index
    %c0_3 = arith.constant 0 : index
    %4 = vector.load %arg8[%c0_2, %c0_3] : memref<32x128xf32, #tpu.memory_space<vmem>>, vector<32x128xf32>
    %cst = arith.constant dense<0.000000e+00> : vector<16x128xf32>
    %5 = tpu.matmul %3, %4, %cst {dimension_numbers = #tpu.dot_dimension_numbers<[1], [0], [0], [1], [0, 0, 1, 1], [], []>} : vector<16x32xf32>, vector<32x128xf32>, vector<16x128xf32> -> vector<16x128xf32>
    %c0_4 = arith.constant 0 : index
    %c0_5 = arith.constant 0 : index
    %6 = vector.load %arg9[%c0_4, %c0_5] : memref<1x128xf32, #tpu.memory_space<vmem>>, vector<1x128xf32>
    %7 = vector.broadcast %6 : vector<1x128xf32> to vector<16x128xf32>
    %8 = arith.addf %5, %7 : vector<16x128xf32>
    %cst_6 = arith.constant 5.000000e-01 : f32
    %9 = vector.broadcast %cst_6 : f32 to vector<16x128xf32>
    %10 = arith.mulf %8, %9 : vector<16x128xf32>
    %cst_7 = arith.constant 0.707106769 : f32
    %11 = vector.broadcast %cst_7 : f32 to vector<16x128xf32>
    %12 = arith.mulf %8, %11 : vector<16x128xf32>
    %13 = math.absf %12 : vector<16x128xf32>
    %cst_8 = arith.constant 0.327591091 : f32
    %14 = vector.broadcast %cst_8 : f32 to vector<16x128xf32>
    %15 = arith.mulf %14, %13 : vector<16x128xf32>
    %cst_9 = arith.constant 1.000000e+00 : f32
    %16 = vector.broadcast %cst_9 : f32 to vector<16x128xf32>
    %17 = arith.addf %16, %15 : vector<16x128xf32>
    %cst_10 = arith.constant 1.000000e+00 : f32
    %18 = vector.broadcast %cst_10 : f32 to vector<16x128xf32>
    %19 = arith.divf %18, %17 : vector<16x128xf32>
    %cst_11 = arith.constant 1.06140542 : f32
    %20 = vector.broadcast %cst_11 : f32 to vector<16x128xf32>
    %21 = arith.mulf %20, %19 : vector<16x128xf32>
    %cst_12 = arith.constant -1.45315206 : f32
    %22 = vector.broadcast %cst_12 : f32 to vector<16x128xf32>
    %23 = arith.addf %21, %22 : vector<16x128xf32>
    %24 = arith.mulf %23, %19 : vector<16x128xf32>
    %cst_13 = arith.constant 1.42141378 : f32
    %25 = vector.broadcast %cst_13 : f32 to vector<16x128xf32>
    %26 = arith.addf %24, %25 : vector<16x128xf32>
    %27 = arith.mulf %26, %19 : vector<16x128xf32>
    %cst_14 = arith.constant -0.284496725 : f32
    %28 = vector.broadcast %cst_14 : f32 to vector<16x128xf32>
    %29 = arith.addf %27, %28 : vector<16x128xf32>
    %30 = arith.mulf %29, %19 : vector<16x128xf32>
    %cst_15 = arith.constant 0.254829586 : f32
    %31 = vector.broadcast %cst_15 : f32 to vector<16x128xf32>
    %32 = arith.addf %30, %31 : vector<16x128xf32>
    %33 = arith.mulf %32, %19 : vector<16x128xf32>
    %cst_16 = arith.constant 0.000000e+00 : f32
    %34 = vector.broadcast %cst_16 : f32 to vector<16x128xf32>
    %35 = arith.subf %34, %13 : vector<16x128xf32>
    %36 = arith.mulf %35, %13 : vector<16x128xf32>
    %37 = math.exp %36 : vector<16x128xf32>
    %38 = arith.mulf %33, %37 : vector<16x128xf32>
    %cst_17 = arith.constant 1.000000e+00 : f32
    %39 = vector.broadcast %cst_17 : f32 to vector<16x128xf32>
    %40 = arith.subf %39, %38 : vector<16x128xf32>
    %cst_18 = arith.constant 0.000000e+00 : f32
    %41 = vector.broadcast %cst_18 : f32 to vector<16x128xf32>
    %42 = arith.cmpf olt, %12, %41 : vector<16x128xf32>
    %cst_19 = arith.constant 0.000000e+00 : f32
    %43 = vector.broadcast %cst_19 : f32 to vector<16x128xf32>
    %44 = arith.subf %43, %40 : vector<16x128xf32>
    %45 = arith.select %42, %44, %40 : vector<16x128xi1>, vector<16x128xf32>
    %cst_20 = arith.constant 1.000000e+00 : f32
    %46 = vector.broadcast %cst_20 : f32 to vector<16x128xf32>
    %47 = arith.addf %46, %45 : vector<16x128xf32>
    %48 = arith.mulf %10, %47 : vector<16x128xf32>
    %c0_21 = arith.constant 0 : index
    %c0_22 = arith.constant 0 : index
    %49 = vector.load %arg16[%c0_21, %c0_22] : memref<16x32xf32, #tpu.memory_space<vmem>>, vector<16x32xf32>
    %c0_23 = arith.constant 0 : index
    %c0_24 = arith.constant 0 : index
    %50 = vector.load %arg10[%c0_23, %c0_24] : memref<128x32xf32, #tpu.memory_space<vmem>>, vector<128x32xf32>
    %cst_25 = arith.constant dense<0.000000e+00> : vector<16x32xf32>
    %51 = tpu.matmul %48, %50, %cst_25 {dimension_numbers = #tpu.dot_dimension_numbers<[1], [0], [0], [1], [0, 0, 1, 1], [], []>} : vector<16x128xf32>, vector<128x32xf32>, vector<16x32xf32> -> vector<16x32xf32>
    %52 = arith.addf %49, %51 : vector<16x32xf32>
    %c0_26 = arith.constant 0 : index
    %c0_27 = arith.constant 0 : index
    %53 = vector.load %arg16[%c0_26, %c0_27] : memref<16x32xf32, #tpu.memory_space<vmem>>, vector<16x32xf32>
    tpu.vector_store %arg16[%c0_26, %c0_27], %52 {strides = array<i32>} : memref<16x32xf32, #tpu.memory_space<vmem>>, vector<16x32xf32>,
    %c0_i32_28 = arith.constant 0 : i32
    %54 = arith.cmpi eq, %arg1, %c0_i32_28 : i32
    %55 = arith.extui %54 : i1 to i32
    %c0_i32_29 = arith.constant 0 : i32
    %56 = arith.cmpi ne, %55, %c0_i32_29 : i32
    scf.if %56 {
      %c0_30 = arith.constant 0 : index
      %c0_31 = arith.constant 0 : index
      %57 = vector.load %arg16[%c0_30, %c0_31] : memref<16x32xf32, #tpu.memory_space<vmem>>, vector<16x32xf32>
      %c0_32 = arith.constant 0 : index
      %c0_33 = arith.constant 0 : index
      %58 = vector.load %arg11[%c0_32, %c0_33] : memref<1x32xf32, #tpu.memory_space<vmem>>, vector<1x32xf32>
      %59 = vector.broadcast %58 : vector<1x32xf32> to vector<16x32xf32>
      %60 = arith.addf %57, %59 : vector<16x32xf32>
      %c0_34 = arith.constant 0 : index
      %c0_35 = arith.constant 0 : index
      %61 = vector.load %arg15[%c0_34, %c0_35] : memref<16x32xf32, #tpu.memory_space<vmem>>, vector<16x32xf32>
      %62 = arith.addf %60, %61 : vector<16x32xf32>
      %c0_36 = arith.constant 0 : index
      %c0_37 = arith.constant 0 : index
      %63 = vector.load %arg12[%c0_36, %c0_37] : memref<1x32xf32, #tpu.memory_space<vmem>>, vector<1x32xf32>
      %c0_38 = arith.constant 0 : index
      %c0_39 = arith.constant 0 : index
      %64 = vector.load %arg13[%c0_38, %c0_39] : memref<1x32xf32, #tpu.memory_space<vmem>>, vector<1x32xf32>
      %cst_40 = arith.constant dense<0.000000e+00> : vector<16xf32>
      %65 = vector.multi_reduction <add>, %62, %cst_40 [1] : vector<16x32xf32> to vector<16xf32>
      %66 = vector.shape_cast %65 : vector<16xf32> to vector<16x1xf32>
      %cst_41 = arith.constant 3.200000e+01 : f32
      %67 = vector.broadcast %cst_41 : f32 to vector<16x1xf32>
      %68 = arith.divf %66, %67 : vector<16x1xf32>
      %69 = vector.broadcast %68 : vector<16x1xf32> to vector<16x32xf32>
      %70 = arith.subf %62, %69 : vector<16x32xf32>
      %71 = arith.mulf %70, %70 : vector<16x32xf32>
      %cst_42 = arith.constant dense<0.000000e+00> : vector<16xf32>
      %72 = vector.multi_reduction <add>, %71, %cst_42 [1] : vector<16x32xf32> to vector<16xf32>
      %73 = vector.shape_cast %72 : vector<16xf32> to vector<16x1xf32>
      %cst_43 = arith.constant 3.200000e+01 : f32
      %74 = vector.broadcast %cst_43 : f32 to vector<16x1xf32>
      %75 = arith.divf %73, %74 : vector<16x1xf32>
      %cst_44 = arith.constant 9.99999996E-13 : f32
      %76 = vector.broadcast %cst_44 : f32 to vector<16x1xf32>
      %77 = arith.addf %75, %76 : vector<16x1xf32>
      %78 = math.rsqrt %77 : vector<16x1xf32>
      %79 = vector.broadcast %78 : vector<16x1xf32> to vector<16x32xf32>
      %80 = arith.mulf %70, %79 : vector<16x32xf32>
      %81 = vector.broadcast %63 : vector<1x32xf32> to vector<16x32xf32>
      %82 = arith.mulf %80, %81 : vector<16x32xf32>
      %83 = vector.broadcast %64 : vector<1x32xf32> to vector<16x32xf32>
      %84 = arith.addf %82, %83 : vector<16x32xf32>
      %c0_45 = arith.constant 0 : index
      %c0_46 = arith.constant 0 : index
      %85 = vector.load %arg14[%c0_45, %c0_46] : memref<16x32xf32, #tpu.memory_space<vmem>>, vector<16x32xf32>
      tpu.vector_store %arg14[%c0_45, %c0_46], %84 {strides = array<i32>} : memref<16x32xf32, #tpu.memory_space<vmem>>, vector<16x32xf32>,
    } else {
    }
    return
  }
  func.func @transform_0(%arg0: i32, %arg1: i32) -> (i32, i32) {
    %c0_i32 = arith.constant 0 : i32
    %c0_i32_0 = arith.constant 0 : i32
    return %arg0, %c0_i32 : i32, i32
  }
  func.func @transform_1(%arg0: i32, %arg1: i32) -> (i32, i32) {
    %c0_i32 = arith.constant 0 : i32
    %c0_i32_0 = arith.constant 0 : i32
    return %arg0, %c0_i32 : i32, i32
  }
  func.func @transform_2(%arg0: i32, %arg1: i32) -> (i32, i32) {
    %c0_i32 = arith.constant 0 : i32
    %c0_i32_0 = arith.constant 0 : i32
    %c0_i32_1 = arith.constant 0 : i32
    return %c0_i32, %c0_i32_0 : i32, i32
  }
  func.func @transform_3(%arg0: i32, %arg1: i32) -> (i32, i32) {
    %c0_i32 = arith.constant 0 : i32
    %c0_i32_0 = arith.constant 0 : i32
    %c0_i32_1 = arith.constant 0 : i32
    return %c0_i32, %c0_i32_0 : i32, i32
  }
  func.func @transform_4(%arg0: i32, %arg1: i32) -> (i32, i32) {
    %c0_i32 = arith.constant 0 : i32
    %c0_i32_0 = arith.constant 0 : i32
    %c0_i32_1 = arith.constant 0 : i32
    return %c0_i32, %c0_i32_0 : i32, i32
  }
  func.func @transform_5(%arg0: i32, %arg1: i32) -> (i32, i32) {
    %c0_i32 = arith.constant 0 : i32
    %c0_i32_0 = arith.constant 0 : i32
    %c0_i32_1 = arith.constant 0 : i32
    return %c0_i32, %c0_i32_0 : i32, i32
  }
  func.func @transform_6(%arg0: i32, %arg1: i32) -> (i32, i32) {
    %c0_i32 = arith.constant 0 : i32
    %c0_i32_0 = arith.constant 0 : i32
    return %c0_i32, %arg1 : i32, i32
  }
  func.func @transform_7(%arg0: i32, %arg1: i32) -> (i32, i32) {
    %c0_i32 = arith.constant 0 : i32
    %c0_i32_0 = arith.constant 0 : i32
    return %c0_i32, %arg1 : i32, i32
  }
  func.func @transform_8(%arg0: i32, %arg1: i32) -> (i32, i32) {
    %c0_i32 = arith.constant 0 : i32
    %c0_i32_0 = arith.constant 0 : i32
    return %arg1, %c0_i32 : i32, i32
  }
  func.func @transform_9(%arg0: i32, %arg1: i32) -> (i32, i32) {
    %c0_i32 = arith.constant 0 : i32
    %c0_i32_0 = arith.constant 0 : i32
    %c0_i32_1 = arith.constant 0 : i32
    return %c0_i32, %c0_i32_0 : i32, i32
  }
  func.func @transform_10(%arg0: i32, %arg1: i32) -> (i32, i32) {
    %c0_i32 = arith.constant 0 : i32
    %c0_i32_0 = arith.constant 0 : i32
    %c0_i32_1 = arith.constant 0 : i32
    return %c0_i32, %c0_i32_0 : i32, i32
  }
  func.func @transform_11(%arg0: i32, %arg1: i32) -> (i32, i32) {
    %c0_i32 = arith.constant 0 : i32
    %c0_i32_0 = arith.constant 0 : i32
    %c0_i32_1 = arith.constant 0 : i32
    return %c0_i32, %c0_i32_0 : i32, i32
  }
  func.func @transform_12(%arg0: i32, %arg1: i32) -> (i32, i32) {
    %c0_i32 = arith.constant 0 : i32
    %c0_i32_0 = arith.constant 0 : i32
    return %arg0, %c0_i32 : i32, i32
  }
}

</mosaic_0001>

<bundles_post_ra>
// kernel: bert_layer_pallas.4
= control target key start
LH: loop header
LB: loop body
LE: loop exit
PB: predicated region body
PF: predicated region fallthrough
CT: control target
= control target key end

     0   :  { %s756_s15 = smov 0   ;;  %s758_s16 = smov 0   ;;  %s828_s0 = inlined_call_operand.vmem [shape: f32[2,4,8,8], index: 0, kind: input, shape index: {}]   ;;  %s829_s1 = inlined_call_operand.vmem [shape: f32[2,4,8,8], index: 1, kind: input, shape index: {}]   ;;  %s830_s2 = inlined_call_operand.vmem [shape: f32[2,4,8,8], index: 2, kind: input, shape index: {}]   ;;  %s831_s3 = inlined_call_operand.vmem [shape: f32[2,1,1,8], index: 3, kind: input, shape index: {}]   ;;  %s832_s4 = inlined_call_operand.vmem [shape: f32[2,4,8,8], index: 4, kind: output, shape index: {}]  }
   0x1   :  { %s760_s17 = smov 0   ;;  %s762_s18 = smov 0  }
   0x2   :  { %s764_s19 = smov 0  }
   0x3 LB: > { %s23_s20 = sadd.s32 1, %s719_s17  ;;  %s26_s21 = sadd.s32 1, %s723_s18  ;;  %s727_s19 = sphi %s764_s19, %s14_s19   ;;  %s723_s18 = sphi %s762_s18, %s836_s18   ;;  %s719_s17 = sphi %s760_s17, %s835_s17   ;;  %s715_s16 = sphi %s758_s16, %s834_s16   ;;  %s711_s15 = sphi %s756_s15, %s833_s15  }
   0x4   : > { %p24_p0 = scmp.ge.s32.totalorder %s23_s20, 4  ;;  %p614_p1 = scmp.ge.s32.totalorder %s727_s19, 1 }
   0x5   : > { %p219_p2 = scmp.lt.s32.totalorder %s727_s19, 9 }
   0x6   : > { %s838_s20 = smov (%p24_p0, %s23_s20), 0  ;;  %s840_s21 = smov (!%p24_p0, %s26_s21), %s723_s18 }
   0x7   : > { %p220_p3 = pnand %p614_p1, %p219_p2  ;;  %p28_p4 = scmp.ge.s32.totalorder %s840_s21, 2 }
   0x8   : > { %p270_p5 = scmp.lt.s32.totalorder (!%p220_p3), %s715_s16, 1  ;;  %p272_p6 = scmp.lt.s32.totalorder (!%p220_p3), %s711_s15, 3  ;;  %v729_v0 = vmov (!%p220_p3), 0.0   ;;  %vm730_vm0 = vmmov (!%p220_p3), 0   ;;  %vm309_vm1 = vcmask (!%p220_p3), 64512  }
   0x9   : > { %s842_s21 = smov (%p28_p4, %s840_s21), 0  ;;  %223 = sbr.rel (%p220_p3) target bundleno = 768 (0x300), region = 36 }
   0xa   : > { %633 = vmatprep.subr.mxu0 (!%p220_p3), %v729_v0  ;;  %635 = vmatprep.mubr.msk.f32.mxu0 (!%p220_p3), %vm730_vm0, %v729_v0 }
   0xb   : > { %638 = vmatprep.subr.mxu1 (!%p220_p3), %v729_v0  ;;  %640 = vmatprep.mubr.msk.f32.mxu1 (!%p220_p3), %vm730_vm0, %v729_v0 }
  0x10   : > { %s844_s16 = smov (!%p270_p5, %s715_s16), 1  ;;  %s846_s15 = smov (!%p272_p6, %s711_s15), 3 }
  0x11   : > { %s615_s22 = sshll.u32 %s844_s16, 2  ;;  %s296_s7 = scalar_lea.vmem %s831_s3, %s844_s16 }
  0x12   : > { %s275_s23 = sadd.s32 %s615_s22, %s846_s15  ;;  %v625_v4 = vld [vmem:[%s296_s7] ss:$0 sm:$0xff] }
  0x13   : > { %s786_s24 = sshll.u32 %s275_s23, 3 }
  0x14   : > { %s285_s27 = scalar_lea.vmem %s829_s1, %s786_s24  ;;  %s277_s30 = scalar_lea.vmem %s828_s0, %s786_s24 }
  0x15   : > { %v306_v1 = vld [vmem:[%s285_s27] sm:$0xff]  ;;  %s293_s10 = scalar_lea.vmem %s830_s2, %s786_s24  ;;  %s304_s13 = scalar_lea.vmem %s832_s4, %s786_s24 }
  0x16   : > { %634 = vmatpush3.xpose.msk.msra.mxu0 %vm309_vm1, %v306_v1  ;;  %v305_v2 = vld [vmem:[%s277_s30] sm:$0xff] }
  0x17   : > { %v307_v14 = vld [vmem:[%s293_s10] sm:$0xff] }
  0x18   : > { %639 = vmatpush3.msra.mxu1 %v307_v14 }
  0x19   : > { %636 = vmatmul.mubr.msk.f32.vlgmr.msra.gmra.mrb[0].mxu0 %vm309_vm1, %v305_v2 }
  0xec   : > { %v382_v3 = vpop.f32.mrb[0].mxu0 }
  0xed   : > { %v386_v5 = vmul.f32 0.35355338, %v382_v3  ;;  %v637_v6 = vpop.f32.mrb[1].mxu0 }
  0xef   : > { %v393_v7 = vadd.f32 %v625_v4, %v386_v5 }
  0xf1   : > { %v394_v8 = vsel %vm309_vm1, %v393_v7, -inf }
  0xf2   : > { %395 = vmax.xlane.f32.xlu0 %v394_v8 }
 0x17f   : > { %v396_v9 = vpop.xlane.xlu0 %395 }
 0x180   : > { %v397_v10 = vsub.f32 %v393_v7, %v396_v9 }
 0x182   : > { %v398_v11 = vmul.f32 1.442695, %v397_v10 }
 0x184   : > { %685 = vpow2.f32 %v398_v11 }
 0x18e   : > { %v686_v12 = vpop.eup %685 }
 0x18f   : > { %v400_v13 = vsel %vm309_vm1, %v686_v12, 0.0 }
 0x190   : > { %401 = vadd.xlane.f32.xlu0 %v400_v13 }
 0x21d   : > { %v402_v15 = vpop.xlane.xlu0 %401 }
 0x21e   : > { %687 = vrcp.f32 %v402_v15 }
 0x228   : > { %v688_v16 = vpop.eup %687 }
 0x229   : > { %v404_v17 = vmul.f32 %v688_v16, %v686_v12 }
 0x22b   : > { %641 = vmatmul.mubr.msk.f32.vlgmr.msra.gmra.mrb[0].mxu1 %vm309_vm1, %v404_v17 }
 0x2fe   : > { %v474_v18 = vpop.f32.mrb[0].mxu1 }
 0x2ff   : > { %478 = vst.msk [vmem:[%s304_s13] sm:$0xff] %vm309_vm1, %v474_v18  ;;  %v642_v19 = vpop.f32.mrb[1].mxu1 }
 0x300 PF: > { %s14_s19 = sadd.s32 1, %s727_s19   ;;  %s833_s15 = smov %s719_s17 }
 0x301   : > { %p11_p7 = scmp.ge.s32.totalorder %s14_s19, 10   ;;  %s834_s16 = smov %s723_s18 }
 0x302   : > { %s835_s17 = smov %s838_s20  ;;  %s836_s18 = smov %s842_s21 }
 0x303   :  { %13 = sbr.rel (!%p11_p7) target bundleno = 3 (0x3), region = 75 }

// kernel: bert_layer_pallas.3
= control target key start
LH: loop header
LB: loop body
LE: loop exit
PB: predicated region body
PF: predicated region fallthrough
CT: control target
= control target key end

     0   :  { %15 = vsyncpa [#allocation3], 0  ;;  %s615_s0 = inlined_call_operand.vmem [shape: f32[16,32], index: 0, kind: input, shape index: {}]   ;;  %s616_s1 = inlined_call_operand.vmem [shape: f32[32,32], index: 1, kind: input, shape index: {}]   ;;  %s617_s2 = inlined_call_operand.vmem [shape: f32[1,32], index: 2, kind: input, shape index: {}]   ;;  %s618_s3 = inlined_call_operand.hbm [shape: f32[32,32], index: 3, kind: input, shape index: {}]   ;;  %s619_s4 = inlined_call_operand.vmem [shape: f32[1,32], index: 4, kind: input, shape index: {}]   ;;  %s620_s5 = inlined_call_operand.hbm [shape: f32[32,32], index: 5, kind: input, shape index: {}]   ;;  %s621_s6 = inlined_call_operand.vmem [shape: f32[1,32], index: 6, kind: input, shape index: {}]   ;;  %s622_s7 = inlined_call_operand.vmem [shape: f32[16,32], index: 7, kind: output, shape index: {0}]   ;;  %s623_s8 = inlined_call_operand.vmem [shape: f32[16,32], index: 8, kind: output, shape index: {1}]   ;;  %s624_s9 = inlined_call_operand.vmem [shape: f32[16,32], index: 9, kind: output, shape index: {2}]  }
   0x1   :  { %16 = vsyncpa [#allocation5], 0  ;;  %s480_s30 = smov [#allocation2]   ;;  %s432_s13 = scalar_lea.hbm %s618_s3, 512 }
   0x2   :  { %s28_s10 = sshll.u32 %s480_s30, 4  ;;  %p433_p0 = scmp.ne.s32.totalorder %s618_s3, %s432_s13  ;;  %s29_s10 = int_to_ptr.vmem [resolvable:$true] %s28_s10 }
   0x3   :  { %p436_p1 = scmp.lt.u32.totalorder %s432_s13, %s618_s3 }
   0x5   :  { %p438_p2 = pnand %p436_p1, %p433_p0 }
   0x7   :  { %441 = shalt.err (!%p438_p2)
}
   0x8   :  { %s442_s18 = scalar_lea.vmem %s29_s10, 512  ;;  %p447_p4 = scmp.lt.s32.totalorder %s29_s10, %s29_s10 }
   0x9   :  { %p443_p3 = scmp.ne.s32.totalorder %s29_s10, %s442_s18  ;;  %p448_p5 = scmp.lt.s32.totalorder %s442_s18, %s442_s18 }
   0xb   :  { %p449_p6 = por %p448_p5, %p447_p4 }
   0xd   :  { %p450_p7 = pnand %p449_p6, %p443_p3 }
   0xf   :  { %453 = shalt.err (!%p450_p7)
}
  0x10   :  { %s481_s19 = smov 128   ;;  %s482_s20 = smov 8  }
  0x11   :  { %34 = dma.hbm_to_vmem [thread:$0]  %s618_s3, 512, %s29_s10, [#allocation3], %s481_s19, %s481_s19, %s482_s20  }
  0x12   :  { %s483_s23 = smov [#allocation4]   ;;  %s454_s27 = scalar_lea.hbm %s620_s5, 512 }
  0x13   :  { %s42_s24 = sshll.u32 %s483_s23, 4  ;;  %p455_p8 = scmp.ne.s32.totalorder %s620_s5, %s454_s27  ;;  %s43_s24 = int_to_ptr.vmem [resolvable:$true] %s42_s24 }
  0x14   :  { %p458_p9 = scmp.lt.u32.totalorder %s454_s27, %s620_s5 }
  0x16   :  { %p460_p10 = pnand %p458_p9, %p455_p8 }
  0x18   :  { %463 = shalt.err (!%p460_p10)
}
  0x19   :  { %s464_s12 = scalar_lea.vmem %s43_s24, 512  ;;  %p469_p12 = scmp.lt.s32.totalorder %s43_s24, %s43_s24 }
  0x1a   :  { %p465_p11 = scmp.ne.s32.totalorder %s43_s24, %s464_s12  ;;  %p470_p13 = scmp.lt.s32.totalorder %s464_s12, %s464_s12 }
  0x1c   :  { %p471_p0 = por %p470_p13, %p469_p12 }
  0x1e   :  { %p472_p1 = pnand %p471_p0, %p465_p11 }
  0x20   :  { %475 = shalt.err (!%p472_p1)
}
  0x21   :  { %48 = dma.hbm_to_vmem [thread:$0]  %s620_s5, 512, %s43_s24, [#allocation5], %s481_s19, %s481_s19, %s482_s20  }
  0x22   :  { %476 = dma.done.wait [#allocation3], 512  }
  0x23   :  { %477 = vsyncadd [#allocation3], 4294966784 }
  0x24   :  { %478 = dma.done.wait [#allocation5], 512  }
  0x25   :  { %479 = vsyncadd [#allocation5], 4294966784  ;;  %vm70_vm0 = vcmask 261120   ;;  %v59_v0 = vld [vmem:[%s616_s1] sm:$0xff]  ;;  %v60_v1 = vld [vmem:[%s616_s1 + $0x8] sm:$0xff] }
  0x26   :  { %v61_v2 = vld [vmem:[%s616_s1 + $0x10] sm:$0xff]  ;;  %v404_v3 = vpack.c.bf16 %v60_v1, %v59_v0  ;;  %v62_v4 = vld [vmem:[%s616_s1 + $0x18] sm:$0xff]  ;;  %v57_v5 = vld [vmem:[%s615_s0] sm:$0xff] }
  0x27   :  { %v152_v6 = vld [vmem:[#allocation2] sm:$0xff]  ;;  %v408_v7 = vpack.c.bf16 %v62_v4, %v61_v2  ;;  %379 = vmatprep.mubr.msk.f32.mxu0 %vm70_vm0, %v57_v5  ;;  %v153_v8 = vld [vmem:[#allocation2 + $0x8] sm:$0xff]  ;;  %390 = vmatprep.mubr.msk.f32.mxu1 %vm70_vm0, %v57_v5  ;;  %v154_v12 = vld [vmem:[#allocation2 + $0x10] sm:$0xff] }
  0x28   :  { %v238_v9 = vld [vmem:[#allocation4] sm:$0xff]  ;;  %405 = vmatprep.subr.bf16.mxu0 %v404_v3  ;;  %v412_v10 = vpack.c.bf16 %v153_v8, %v152_v6  ;;  %v239_v11 = vld [vmem:[#allocation4 + $0x8] sm:$0xff]  ;;  %v155_v13 = vld [vmem:[#allocation2 + $0x18] sm:$0xff] }
  0x29   :  { %407 = vmatpush3.bf16.msra.mxu0 %v404_v3  ;;  %v416_v14 = vpack.c.bf16 %v155_v13, %v154_v12  ;;  %v420_v15 = vpack.c.bf16 %v239_v11, %v238_v9  ;;  %v240_v16 = vld [vmem:[#allocation4 + $0x10] sm:$0xff]  ;;  %v241_v17 = vld [vmem:[#allocation4 + $0x18] sm:$0xff]  ;;  %v58_v18 = vld [vmem:[%s615_s0 + $0x8] sm:$0xff] }
  0x2a   :  { %409 = vmatprep.subr.bf16.mxu0 %v408_v7  ;;  %413 = vmatprep.subr.bf16.mxu1 %v412_v10  ;;  %v424_v19 = vpack.c.bf16 %v241_v17, %v240_v16  ;;  %v344_v20 = vld [vmem:[%s617_s2] ss:$0 sm:$0xff] }
  0x2b   :  { %415 = vmatpush3.bf16.msra.mxu1 %v412_v10  ;;  %v347_v22 = vld [vmem:[%s619_s4] ss:$0 sm:$0xff] }
  0x2c   :  { %417 = vmatprep.subr.bf16.mxu1 %v416_v14  ;;  %v350_v30 = vld [vmem:[%s621_s6] ss:$0 sm:$0xff] }
  0x2d   :  { %411 = vmatpush3.bf16.msra.mxu0 %v408_v7 }
  0x2e   :  { %421 = vmatprep.subr.bf16.mxu0 %v420_v15 }
  0x2f   :  { %419 = vmatpush3.bf16.msra.mxu1 %v416_v14 }
  0x30   :  { %380 = vmatmul.mubr.msk.f32.vlgmr.msra.gmra.mrb[0].mxu0 %vm70_vm0, %v58_v18 }
  0x31   :  { %423 = vmatpush3.bf16.msra.mxu0 %v420_v15  ;;  %401 = vmatprep.mubr.msk.f32.mxu0 %vm70_vm0, %v57_v5 }
  0x32   :  { %425 = vmatprep.subr.bf16.mxu0 %v424_v19  ;;  %391 = vmatmul.mubr.msk.f32.vlgmr.msra.gmra.mrb[0].mxu1 %vm70_vm0, %v58_v18 }
  0x35   :  { %427 = vmatpush3.bf16.msra.mxu0 %v424_v19 }
  0x38   :  { %402 = vmatmul.mubr.msk.f32.vlgmr.msra.gmra.mrb[2].mxu0 %vm70_vm0, %v58_v18 }
 0x103   :  { %v381_v21 = vpop.f32.mrb[0].mxu0 }
 0x104   :  { %v149_v23 = vadd.f32 %v381_v21, %v344_v20  ;;  %v143_v24 = vpop.f32.mrb[1].mxu0 }
 0x105   :  { %v144_v25 = vadd.f32 %v344_v20, %v143_v24  ;;  %v392_v26 = vpop.f32.mrb[0].mxu1 }
 0x106   :  { %325 = vst.msk [vmem:[%s622_s7 + $0x8] sm:$0xff] %vm70_vm0, %v149_v23  ;;  %v235_v27 = vadd.f32 %v392_v26, %v347_v22  ;;  %v229_v28 = vpop.f32.mrb[1].mxu1 }
 0x107   :  { %324 = vst.msk [vmem:[%s622_s7] sm:$0xff] %vm70_vm0, %v144_v25  ;;  %v230_v29 = vadd.f32 %v347_v22, %v229_v28 }
 0x108   :  { %327 = vst.msk [vmem:[%s623_s8 + $0x8] sm:$0xff] %vm70_vm0, %v235_v27 }
 0x109   :  { %326 = vst.msk [vmem:[%s623_s8] sm:$0xff] %vm70_vm0, %v230_v29 }
 0x10b   :  { %v403_v31 = vpop.f32.mrb[2].mxu0 }
 0x10c   :  { %v321_v32 = vadd.f32 %v403_v31, %v350_v30  ;;  %v315_v33 = vpop.f32.mrb[3].mxu0 }
 0x10d   :  { %v316_v34 = vadd.f32 %v350_v30, %v315_v33 }
 0x10e   :  { %329 = vst.msk [vmem:[%s624_s9 + $0x8] sm:$0xff] %vm70_vm0, %v321_v32 }
 0x10f   :  { %328 = vst.msk [vmem:[%s624_s9] sm:$0xff] %vm70_vm0, %v316_v34 }
 0x110   :  { %342 = vsyncpa [#allocation3], 1 }
 0x111   :  { %343 = vsyncpa [#allocation5], 1 }

// kernel: bert_layer_pallas.5
= control target key start
LH: loop header
LB: loop body
LE: loop exit
PB: predicated region body
PF: predicated region fallthrough
CT: control target
= control target key end

     0   :  { %vm61_vm0 = vcmask 261120   ;;  %s925_s0 = inlined_call_operand.vmem [shape: f32[16,32], index: 0, kind: input, shape index: {}]   ;;  %s926_s1 = inlined_call_operand.vmem [shape: f32[16,32], index: 1, kind: input, shape index: {}]   ;;  %s927_s2 = inlined_call_operand.vmem [shape: f32[32,32], index: 2, kind: input, shape index: {}]   ;;  %s928_s3 = inlined_call_operand.vmem [shape: f32[1,32], index: 3, kind: input, shape index: {}]   ;;  %s929_s4 = inlined_call_operand.vmem [shape: f32[1,32], index: 4, kind: input, shape index: {}]   ;;  %s930_s5 = inlined_call_operand.vmem [shape: f32[1,32], index: 5, kind: input, shape index: {}]   ;;  %s931_s6 = inlined_call_operand.vmem [shape: f32[32,128], index: 6, kind: input, shape index: {}]   ;;  %s932_s7 = inlined_call_operand.vmem [shape: f32[1,128], index: 7, kind: input, shape index: {}]   ;;  %s933_s8 = inlined_call_operand.vmem [shape: f32[128,32], index: 8, kind: input, shape index: {}]   ;;  %s934_s9 = inlined_call_operand.vmem [shape: f32[1,32], index: 9, kind: input, shape index: {}]   ;;  %s935_s10 = inlined_call_operand.vmem [shape: f32[1,32], index: 10, kind: input, shape index: {}]   ;;  %s936_s11 = inlined_call_operand.vmem [shape: f32[1,32], index: 11, kind: input, shape index: {}]   ;;  %s937_s12 = inlined_call_operand.hbm [shape: f32[16,32], index: 12, kind: output, shape index: {}]  }
   0x1   :  { %v50_v0 = vld [vmem:[%s927_s2] sm:$0xff]  ;;  %v51_v1 = vld [vmem:[%s927_s2 + $0x8] sm:$0xff]  ;;  %v52_v2 = vld [vmem:[%s927_s2 + $0x10] sm:$0xff] }
   0x2   :  { %v619_v3 = vpack.c.bf16 %v51_v1, %v50_v0  ;;  %v53_v4 = vld [vmem:[%s927_s2 + $0x18] sm:$0xff]  ;;  %v46_v5 = vld [vmem:[%s925_s0] sm:$0xff] }
   0x3   :  { %v623_v6 = vpack.c.bf16 %v53_v4, %v52_v2  ;;  %570 = vmatprep.mubr.msk.f32.mxu1 %vm61_vm0, %v46_v5 }
   0x4   :  { %17 = vsyncpa [#allocation5], 0  ;;  %620 = vmatprep.subr.bf16.mxu1 %v619_v3  ;;  %v47_v7 = vld [vmem:[%s925_s0 + $0x8] sm:$0xff]  ;;  %v521_v8 = vld [vmem:[%s928_s3] ss:$0 sm:$0xff]  ;;  %s712_s19 = smov [#allocation4]  }
   0x5   :  { %622 = vmatpush3.bf16.msra.mxu1 %v619_v3  ;;  %v48_v11 = vld [vmem:[%s926_s1] sm:$0xff]  ;;  %v49_v14 = vld [vmem:[%s926_s1 + $0x8] sm:$0xff]  ;;  %v198_v32 = vld [vmem:[%s931_s6 + $0x10] sm:$0xff]  ;;  %s510_s0 = sshll.u32 %s712_s19, 4  ;;  %s511_s0 = int_to_ptr.vmem [resolvable:$true] %s510_s0 }
   0x6   :  { %624 = vmatprep.subr.bf16.mxu1 %v623_v6  ;;  %v196_v29 = vld [vmem:[%s931_s6] sm:$0xff]  ;;  %v197_v30 = vld [vmem:[%s931_s6 + $0x8] sm:$0xff]  ;;  %v199_v33 = vld [vmem:[%s931_s6 + $0x18] sm:$0xff]  ;;  %s687_s1 = scalar_lea.vmem %s511_s0, 256  ;;  %p692_p1 = scmp.lt.s32.totalorder %s511_s0, %s511_s0 }
   0x7   :  { %v627_v31 = vpack.c.bf16 %v197_v30, %v196_v29  ;;  %v631_v34 = vpack.c.bf16 %v199_v33, %v198_v32  ;;  %v524_v42 = vld [vmem:[%s929_s4] ss:$0 sm:$0xff]  ;;  %v346_v54 = vld [vmem:[%s933_s8 + $0x8] sm:$0xff]  ;;  %v347_v55 = vld [vmem:[%s933_s8 + $0x10] sm:$0xff]  ;;  %p688_p0 = scmp.ne.s32.totalorder %s511_s0, %s687_s1  ;;  %p693_p2 = scmp.lt.s32.totalorder %s687_s1, %s687_s1 }
   0x8   :  { %v525_v44 = vld [vmem:[%s930_s5] ss:$0 sm:$0xff]  ;;  %v348_v57 = vld [vmem:[%s933_s8 + $0x18] sm:$0xff]  ;;  %v350_v60 = vld [vmem:[%s933_s8 + $0x28] sm:$0xff] }
   0x9   :  { %626 = vmatpush3.bf16.msra.mxu1 %v623_v6  ;;  %v345_v53 = vld [vmem:[%s933_s8] sm:$0xff]  ;;  %v639_v58 = vpack.c.bf16 %v348_v57, %v347_v55  ;;  %v351_v62 = vld [vmem:[%s933_s8 + $0x30] sm:$0xff]  ;;  %v352_v63 = vld [vmem:[%s933_s8 + $0x38] sm:$0xff]  ;;  %p694_p3 = por %p693_p2, %p692_p1 }
   0xa   :  { %628 = vmatprep.subr.bf16.mxu1 %v627_v31  ;;  %v635_v56 = vpack.c.bf16 %v346_v54, %v345_v53  ;;  %v349_v59 = vld [vmem:[%s933_s8 + $0x20] sm:$0xff]  ;;  %v647_v0 = vpack.c.bf16 %v352_v63, %v351_v62  ;;  %v354_v2 = vld [vmem:[%s933_s8 + $0x48] sm:$0xff]  ;;  %v355_v4 = vld [vmem:[%s933_s8 + $0x50] sm:$0xff] }
   0xb   :  { %v643_v61 = vpack.c.bf16 %v350_v60, %v349_v59  ;;  %v353_v1 = vld [vmem:[%s933_s8 + $0x40] sm:$0xff]  ;;  %v356_v5 = vld [vmem:[%s933_s8 + $0x58] sm:$0xff]  ;;  %p695_p4 = pnand %p694_p3, %p688_p0 }
   0xc   :  { %571 = vmatmul.mubr.msk.f32.vlgmr.msra.gmra.mrb[0].mxu1 %vm61_vm0, %v47_v7  ;;  %636 = vmatprep.subr.bf16.mxu0 %v635_v56  ;;  %v651_v3 = vpack.c.bf16 %v354_v2, %v353_v1  ;;  %v655_v6 = vpack.c.bf16 %v356_v5, %v355_v4  ;;  %v357_v7 = vld [vmem:[%s933_s8 + $0x60] sm:$0xff] }
   0xd   :  { %630 = vmatpush3.bf16.msra.mxu1 %v627_v31  ;;  %638 = vmatpush3.bf16.msra.mxu0 %v635_v56 }
   0xe   :  { %632 = vmatprep.subr.bf16.mxu1 %v631_v34  ;;  %640 = vmatprep.subr.bf16.mxu0 %v639_v58 }
  0x11   :  { %634 = vmatpush3.bf16.msra.mxu1 %v631_v34  ;;  %642 = vmatpush3.bf16.msra.mxu0 %v639_v58 }
  0x12   :  { %644 = vmatprep.subr.bf16.mxu0 %v643_v61 }
  0x15   :  { %646 = vmatpush3.bf16.msra.mxu0 %v643_v61 }
  0x16   :  { %648 = vmatprep.subr.bf16.mxu0 %v647_v0 }
  0x19   :  { %650 = vmatpush3.bf16.msra.mxu0 %v647_v0 }
  0x1a   :  { %652 = vmatprep.subr.bf16.mxu0 %v651_v3 }
  0x1d   :  { %654 = vmatpush3.bf16.msra.mxu0 %v651_v3 }
  0x1e   :  { %656 = vmatprep.subr.bf16.mxu0 %v655_v6 }
  0x21   :  { %658 = vmatpush3.bf16.msra.mxu0 %v655_v6 }
  0xdf   :  { %v572_v9 = vpop.f32.mrb[0].mxu1 }
  0xe0   :  { %v134_v10 = vpop.f32.mrb[1].mxu1  ;;  %v140_v12 = vadd.f32 %v572_v9, %v521_v8 }
  0xe1   :  { %v135_v13 = vadd.f32 %v521_v8, %v134_v10  ;;  %v358_v8 = vld [vmem:[%s933_s8 + $0x68] sm:$0xff]  ;;  %v359_v10 = vld [vmem:[%s933_s8 + $0x70] sm:$0xff] }
  0xe2   :  { %v144_v17 = vadd.f32 %v140_v12, %v49_v14  ;;  %v659_v9 = vpack.c.bf16 %v358_v8, %v357_v7  ;;  %v526_v14 = vld [vmem:[%s932_s7] ss:$0 sm:$0xff] }
  0xe3   :  { %v143_v15 = vadd.f32 %v135_v13, %v48_v11  ;;  %v360_v11 = vld [vmem:[%s933_s8 + $0x78] sm:$0xff]  ;;  %v711_v13 = vmov 0.0  }
  0xe4   :  { %v150_v18 = vsel %vm61_vm0, %v144_v17, 0.0  ;;  %660 = vmatprep.subr.bf16.mxu0 %v659_v9  ;;  %v663_v12 = vpack.c.bf16 %v360_v11, %v359_v10  ;;  %193 = vst.msk [vmem:[#allocation3 + $0x8] sm:$0xff] %vm61_vm0, %v711_v13  ;;  %192 = vst.msk [vmem:[#allocation3] sm:$0xff] %vm61_vm0, %v711_v13  ;;  %v529_v13 = vld [vmem:[%s934_s9] ss:$0 sm:$0xff] }
  0xe5   :  { %v147_v16 = vsel %vm61_vm0, %v143_v15, 0.0  ;;  %662 = vmatpush3.bf16.msra.mxu0 %v659_v9 }
  0xe6   :  { %148 = vadd.xlane.f32.xlu0 %v147_v16  ;;  %664 = vmatprep.subr.bf16.mxu0 %v663_v12 }
  0xe9   :  { %666 = vmatpush3.bf16.msra.mxu0 %v663_v12 }
  0xea   :  { %151 = vadd.xlane.f32.xlu0 %v150_v18 }
  0xeb   :  { %v344_v7 = vld [vmem:[#allocation3 + $0x8] sm:$0xff]  ;;  %v343_v8 = vld [vmem:[#allocation3] sm:$0xff] }
 0x173   :  { %v149_v19 = vpop.xlane.xlu0 %148 }
 0x174   :  { %v154_v20 = vmul.f32 0.03125, %v149_v19 }
 0x176   :  { %v156_v21 = vsub.f32 %v143_v15, %v154_v20 }
 0x177   :  { %v152_v22 = vpop.xlane.xlu0 %151 }
 0x178   :  { %v155_v23 = vmul.f32 0.03125, %v152_v22  ;;  %v158_v24 = vmul.f32 %v156_v21, %v156_v21 }
 0x17a   :  { %v157_v25 = vsub.f32 %v144_v17, %v155_v23  ;;  %v160_v26 = vsel %vm61_vm0, %v158_v24, 0.0 }
 0x17b   :  { %161 = vadd.xlane.f32.xlu1 %v160_v26 }
 0x17c   :  { %v159_v27 = vmul.f32 %v157_v25, %v157_v25 }
 0x17e   :  { %v163_v28 = vsel %vm61_vm0, %v159_v27, 0.0 }
 0x17f   :  { %164 = vadd.xlane.f32.xlu1 %v163_v28 }
 0x208   :  { %v162_v35 = vpop.xlane.xlu1 %161 }
 0x209   :  { %v166_v36 = vmul.f32 0.03125, %v162_v35 }
 0x20b   :  { %v168_v37 = vadd.f32 1e-12, %v166_v36 }
 0x20c   :  { %v165_v38 = vpop.xlane.xlu1 %164 }
 0x20d   :  { %671 = vrsqrt.f32 %v168_v37  ;;  %v167_v39 = vmul.f32 0.03125, %v165_v38 }
 0x20f   :  { %v169_v40 = vadd.f32 1e-12, %v167_v39 }
 0x211   :  { %673 = vrsqrt.f32 %v169_v40 }
 0x217   :  { %v672_v41 = vpop.eup %671 }
 0x218   :  { %v172_v43 = vmul.f32 %v672_v41, %v156_v21 }
 0x21a   :  { %v180_v45 = vmul.f32 %v524_v42, %v172_v43 }
 0x21b   :  { %v674_v46 = vpop.eup %673 }
 0x21c   :  { %v188_v47 = vadd.f32 %v525_v44, %v180_v45  ;;  %v173_v48 = vmul.f32 %v674_v46, %v157_v25 }
 0x21e   :  { %190 = vst.msk [vmem:[#allocation2] sm:$0xff] %vm61_vm0, %v188_v47  ;;  %v181_v49 = vmul.f32 %v524_v42, %v173_v48 }
 0x220   :  { %v189_v50 = vadd.f32 %v525_v44, %v181_v49 }
 0x222   :  { %191 = vst.msk [vmem:[#allocation2 + $0x8] sm:$0xff] %vm61_vm0, %v189_v50 }
 0x225   :  { %v833_v51 = vld [vmem:[#allocation2] sm:$0xff] }
 0x226   :  { %581 = vmatprep.mubr.msk.f32.mxu1 %vm61_vm0, %v833_v51 }
 0x229   :  { %v837_v52 = vld [vmem:[#allocation2 + $0x8] sm:$0xff] }
 0x22a   :  { %582 = vmatmul.mubr.msk.f32.vlgmr.msra.gmra.mrb[2].mxu1 %vm61_vm0, %v837_v52 }
 0x2fd   :  { %v583_v15 = vpop.f32.mrb[2].mxu1 }
 0x2fe   :  { %v286_v16 = vadd.f32 %v583_v15, %v526_v14  ;;  %v280_v17 = vpop.f32.mrb[3].mxu1 }
 0x2ff   :  { %v281_v18 = vadd.f32 %v526_v14, %v280_v17 }
 0x300   :  { %v292_v19 = vmul.f32 0.70710677, %v286_v16  ;;  %v290_v4 = vmul.f32 0.5, %v286_v16 }
 0x301   :  { %v291_v20 = vmul.f32 0.70710677, %v281_v18  ;;  %v289_v2 = vmul.f32 0.5, %v281_v18 }
 0x302   :  { %v294_v21 = vand.u32 2147483647, %v292_v19  ;;  %vm334_vm1 = vcmp.lt.f32.partialorder %v292_v19, 0.0 }
 0x303   :  { %v293_v22 = vand.u32 2147483647, %v291_v20  ;;  %vm333_vm2 = vcmp.lt.f32.partialorder %v291_v20, 0.0 }
 0x304   :  { %v296_v23 = vmul.f32 0.3275911, %v294_v21  ;;  %v322_v27 = vsub.f32 0.0, %v294_v21 }
 0x305   :  { %v295_v24 = vmul.f32 0.3275911, %v293_v22  ;;  %v321_v28 = vsub.f32 0.0, %v293_v22 }
 0x306   :  { %v298_v25 = vadd.f32 1.0, %v296_v23  ;;  %v324_v30 = vmul.f32 %v322_v27, %v294_v21 }
 0x307   :  { %v297_v26 = vadd.f32 1.0, %v295_v24  ;;  %v323_v32 = vmul.f32 %v321_v28, %v293_v22 }
 0x308   :  { %675 = vrcp.f32 %v298_v25  ;;  %v327_v36 = vmul.f32 1.442695, %v324_v30 }
 0x309   :  { %677 = vrcp.f32 %v297_v26  ;;  %v325_v38 = vmul.f32 1.442695, %v323_v32 }
 0x30a   :  { %679 = vpow2.f32 %v327_v36 }
 0x30b   :  { %681 = vpow2.f32 %v325_v38 }
 0x312   :  { %v676_v29 = vpop.eup %675 }
 0x313   :  { %v678_v31 = vpop.eup %677  ;;  %v304_v33 = vmul.f32 1.0614054, %v676_v29 }
 0x314   :  { %v303_v34 = vmul.f32 1.0614054, %v678_v31  ;;  %v680_v54 = vpop.eup %679 }
 0x315   :  { %v306_v35 = vadd.f32 -1.4531521, %v304_v33  ;;  %v682_v56 = vpop.eup %681 }
 0x316   :  { %v305_v37 = vadd.f32 -1.4531521, %v303_v34 }
 0x317   :  { %v308_v39 = vmul.f32 %v676_v29, %v306_v35 }
 0x318   :  { %v307_v40 = vmul.f32 %v678_v31, %v305_v37  ;;  %v530_v37 = vld [vmem:[%s935_s10] ss:$0 sm:$0xff] }
 0x319   :  { %v310_v41 = vadd.f32 1.4214138, %v308_v39 }
 0x31a   :  { %v309_v42 = vadd.f32 1.4214138, %v307_v40 }
 0x31b   :  { %v312_v43 = vmul.f32 %v676_v29, %v310_v41  ;;  %v531_v41 = vld [vmem:[%s936_s11] ss:$0 sm:$0xff] }
 0x31c   :  { %v311_v44 = vmul.f32 %v678_v31, %v309_v42 }
 0x31d   :  { %v314_v45 = vadd.f32 -0.28449672, %v312_v43 }
 0x31e   :  { %v313_v46 = vadd.f32 -0.28449672, %v311_v44 }
 0x31f   :  { %v316_v47 = vmul.f32 %v676_v29, %v314_v45 }
 0x320   :  { %v315_v48 = vmul.f32 %v678_v31, %v313_v46 }
 0x321   :  { %v318_v49 = vadd.f32 0.2548296, %v316_v47 }
 0x322   :  { %v317_v50 = vadd.f32 0.2548296, %v315_v48 }
 0x323   :  { %v320_v53 = vmul.f32 %v676_v29, %v318_v49 }
 0x324   :  { %v319_v55 = vmul.f32 %v678_v31, %v317_v50 }
 0x325   :  { %v330_v57 = vmul.f32 %v680_v54, %v320_v53 }
 0x326   :  { %v329_v58 = vmul.f32 %v682_v56, %v319_v55 }
 0x327   :  { %v332_v59 = vsub.f32 1.0, %v330_v57 }
 0x328   :  { %v331_v60 = vsub.f32 1.0, %v329_v58 }
 0x329   :  { %v336_v61 = vsub.f32 0.0, %v332_v59 }
 0x32a   :  { %v335_v62 = vsub.f32 0.0, %v331_v60 }
 0x32b   :  { %v338_v63 = vsel %vm334_vm1, %v336_v61, %v332_v59 }
 0x32c   :  { %v337_v0 = vsel %vm333_vm2, %v335_v62, %v331_v60  ;;  %v340_v1 = vadd.f32 1.0, %v338_v63 }
 0x32d   :  { %v339_v3 = vadd.f32 1.0, %v337_v0 }
 0x32e   :  { %v342_v6 = vmul.f32 %v340_v1, %v290_v4 }
 0x32f   :  { %v341_v5 = vmul.f32 %v339_v3, %v289_v2 }
 0x331   :  { %616 = vmatprep.mubr.f32.mxu0 %v341_v5 }
 0x332   :  { %617 = vmatmul.mubr.f32.vlgmr.msra.gmra.mrb[0].mxu0 %v342_v6 }
 0x405   :  { %v618_v9 = vpop.f32.mrb[0].mxu0 }
 0x406   :  { %v437_v10 = vadd.f32 %v618_v9, %v344_v7  ;;  %v427_v11 = vpop.f32.mrb[1].mxu0 }
 0x407   :  { %v436_v12 = vadd.f32 %v427_v11, %v343_v8 }
 0x408   :  { %439 = vst.msk [vmem:[#allocation3 + $0x8] sm:$0xff] %vm61_vm0, %v437_v10 }
 0x409   :  { %438 = vst.msk [vmem:[#allocation3] sm:$0xff] %vm61_vm0, %v436_v12 }
 0x40f   :  { %v444_v14 = vld [vmem:[#allocation3 + $0x8] sm:$0xff] }
 0x410   :  { %v453_v15 = vadd.f32 %v529_v13, %v444_v14  ;;  %v443_v16 = vld [vmem:[#allocation3] sm:$0xff] }
 0x411   :  { %v452_v17 = vadd.f32 %v529_v13, %v443_v16 }
 0x412   :  { %v457_v18 = vadd.f32 %v453_v15, %v837_v52 }
 0x413   :  { %v456_v19 = vadd.f32 %v452_v17, %v833_v51 }
 0x414   :  { %v463_v20 = vsel %vm61_vm0, %v457_v18, 0.0 }
 0x415   :  { %464 = vadd.xlane.f32.xlu1 %v463_v20  ;;  %v460_v21 = vsel %vm61_vm0, %v456_v19, 0.0 }
 0x416   :  { %461 = vadd.xlane.f32.xlu0 %v460_v21 }
 0x4a2   :  { %v465_v22 = vpop.xlane.xlu1 %464 }
 0x4a3   :  { %v468_v23 = vmul.f32 0.03125, %v465_v22  ;;  %v462_v24 = vpop.xlane.xlu0 %461 }
 0x4a4   :  { %v467_v25 = vmul.f32 0.03125, %v462_v24 }
 0x4a5   :  { %v470_v26 = vsub.f32 %v457_v18, %v468_v23 }
 0x4a6   :  { %v469_v27 = vsub.f32 %v456_v19, %v467_v25 }
 0x4a7   :  { %v472_v28 = vmul.f32 %v470_v26, %v470_v26 }
 0x4a8   :  { %v471_v29 = vmul.f32 %v469_v27, %v469_v27 }
 0x4a9   :  { %v476_v30 = vsel %vm61_vm0, %v472_v28, 0.0 }
 0x4aa   :  { %477 = vadd.xlane.f32.xlu1 %v476_v30  ;;  %v473_v52 = vsel %vm61_vm0, %v471_v29, 0.0 }
 0x4ab   :  { %474 = vadd.xlane.f32.xlu0 %v473_v52 }
 0x537   :  { %v478_v51 = vpop.xlane.xlu1 %477 }
 0x538   :  { %v480_v31 = vmul.f32 0.03125, %v478_v51  ;;  %v475_v32 = vpop.xlane.xlu0 %474 }
 0x539   :  { %v479_v33 = vmul.f32 0.03125, %v475_v32 }
 0x53a   :  { %v482_v34 = vadd.f32 1e-12, %v480_v31 }
 0x53b   :  { %v481_v35 = vadd.f32 1e-12, %v479_v33 }
 0x53c   :  { %683 = vrsqrt.f32 %v482_v34 }
 0x53d   :  { %685 = vrsqrt.f32 %v481_v35 }
 0x546   :  { %v684_v36 = vpop.eup %683 }
 0x547   :  { %v686_v38 = vpop.eup %685  ;;  %v486_v39 = vmul.f32 %v684_v36, %v470_v26 }
 0x548   :  { %v485_v40 = vmul.f32 %v686_v38, %v469_v27 }
 0x549   :  { %v494_v42 = vmul.f32 %v530_v37, %v486_v39 }
 0x54a   :  { %v493_v43 = vmul.f32 %v530_v37, %v485_v40 }
 0x54b   :  { %v502_v44 = vadd.f32 %v531_v41, %v494_v42 }
 0x54c   :  { %v501_v45 = vadd.f32 %v531_v41, %v493_v43 }
 0x54d   :  { %504 = vst.msk [vmem:[#allocation4 + $0x8] sm:$0xff] %vm61_vm0, %v502_v44 }
 0x54e   :  { %503 = vst.msk [vmem:[#allocation4] sm:$0xff] %vm61_vm0, %v501_v45 }
 0x54f   :  { %698 = shalt.err (!%p695_p4)
}
 0x550   :  { %s699_s3 = scalar_lea.hbm %s937_s12, 256 }
 0x551   :  { %p700_p5 = scmp.ne.s32.totalorder %s937_s12, %s699_s3  ;;  %p703_p6 = scmp.lt.u32.totalorder %s699_s3, %s937_s12 }
 0x553   :  { %p705_p7 = pnand %p703_p6, %p700_p5 }
 0x555   :  { %708 = shalt.err (!%p705_p7)
}
 0x556   :  { %s713_s24 = smov 128   ;;  %s714_s25 = smov 8  }
 0x557   :  { %516 = dma.vmem_to_hbm [thread:$0]  %s511_s0, 256, %s937_s12, [#allocation5], %s713_s24, %s713_s24, %s714_s25  }
 0x558   :  { %709 = dma.done.wait [#allocation5], 256  }
 0x559   :  { %710 = vsyncadd [#allocation5], 4294967040 }
 0x55a   :  { %520 = vsyncpa [#allocation5], 1 }

</bundles_post_ra>
